<compile_context>
chip_gen: v7x
topology: tpu7x:2x2x1
jax: 0.10.0
libtpu: 0.0.40
codegen_flags: <defaults>
</compile_context>

<pallas_src>
import functools
import math

import jax
import jax.numpy as jnp
from jax.experimental import pallas as pl
from jax.experimental.pallas import tpu as pltpu


def encoder_layer_kernel(xq_ref, xkv_ref,
                         wq_ref, bq_ref, wkv_ref, bkv_ref,
                         wo_ref, bo_ref,
                         w1_ref, b1_ref, w2_ref, b2_ref,
                         g1_ref, beta1_ref, g2_ref, beta2_ref,
                         o_ref, k_scratch, v_scratch, *, nhead, eps):
    f32 = jnp.float32
    bf16 = jnp.bfloat16

    D = xq_ref.shape[2]
    hd = D // nhead
    qi = pl.program_id(1)

    # ---- K/V projection: computed ONCE per sequence (qi == 0), kept resident
    #      in bf16 VMEM scratch (bias already applied) for all q tiles. ----
    @pl.when(qi == 0)
    def _():
        kv = jnp.dot(xkv_ref[0], wkv_ref[...],
                     preferred_element_type=f32) + bkv_ref[0]        # (S, 2D) f32
        kv = kv.astype(bf16)
        k_scratch[...] = kv[:, :D]
        v_scratch[...] = kv[:, D:]

    x = xq_ref[0].astype(f32)                  # (TQ, D) residual / LayerNorm path
    xb = x.astype(bf16)

    # ---- Q projection: one dense (TQ, D) @ (D, D) matmul.
    #      The 1/sqrt(hd) softmax scale is pre-folded into wq / bq. ----
    q = jnp.dot(xb, wq_ref[...], preferred_element_type=f32) + bq_ref[0]
    q = q.astype(bf16)                         # (TQ, D)

    # ---- attention: static per-head loop; one (TQ, S) score block live at a time ----
    qkT_dims = (((1,), (1,)), ((), ()))        # contract last dims: q @ k^T
    head_outs = []
    for h in range(nhead):
        sl = slice(h * hd, (h + 1) * hd)
        kh = k_scratch[:, sl]                                          # (S, hd) bf16
        vh = v_scratch[:, sl]                                          # (S, hd) bf16
        s = jax.lax.dot_general(q[:, sl], kh, qkT_dims,
                                preferred_element_type=f32)            # (TQ, S) f32
        m = jnp.max(s, axis=-1, keepdims=True)
        p = jnp.exp(s - m)
        l = jnp.sum(p, axis=-1, keepdims=True)
        oh = jnp.dot(p.astype(bf16), vh, preferred_element_type=f32)   # (TQ, hd)
        # approx reciprocal runs on the EUP slot; folded into the small PV output.
        oh = oh * pl.reciprocal(l, approx=True)
        head_outs.append(oh.astype(bf16))

    # Lane-concat heads -> single full-depth output projection (head reduction
    # is fused into the (TQ, D) @ (D, D) contraction).
    o_cat = jnp.concatenate(head_outs, axis=-1)                        # (TQ, D) bf16
    attn_out = jnp.dot(o_cat, wo_ref[...],
                       preferred_element_type=f32) + bo_ref[0]         # (TQ, D) f32

    def layernorm(z, gamma, beta):
        mu = jnp.mean(z, axis=-1, keepdims=True)
        c = z - mu
        var = jnp.mean(c * c, axis=-1, keepdims=True)   # two-pass (stable) variance
        return c * jax.lax.rsqrt(var + eps) * gamma + beta

    # ---- residual + LN1 (post-norm) ----
    src1 = layernorm(x + attn_out, g1_ref[0], beta1_ref[0])

    # ---- FFN: linear1 -> relu -> linear2 (bf16 matmuls, f32 accumulate) ----
    h1 = jnp.dot(src1.astype(bf16), w1_ref[...],
                 preferred_element_type=f32) + b1_ref[0]
    h1 = jnp.maximum(h1, 0.0)
    ff = jnp.dot(h1.astype(bf16), w2_ref[...],
                 preferred_element_type=f32) + b2_ref[0]

    # ---- residual + LN2 ----
    out = layernorm(src1 + ff, g2_ref[0], beta2_ref[0])
    o_ref[0] = out.astype(o_ref.dtype)


def _prepare_weights(params, nhead):
    """One-time wrapper-side re-layout: fused Q / KV weights, bf16 matmul
    operands, f32 biases, and the 1/sqrt(hd) softmax scale folded into wq/bq."""
    f32, bf16 = jnp.float32, jnp.bfloat16
    D = params["wo_t"].shape[0]
    hd = D // nhead
    scale = 1.0 / math.sqrt(hd)
    wqkv = params["wqkv_t"].astype(f32)        # (D, 3D)
    bqkv = params["bqkv"].astype(f32)          # (1, 3D)
    return dict(
        wq=(wqkv[:, :D] * scale).astype(bf16),       # (D, D)   scale folded
        bq=bqkv[:, :D] * scale,                      # (1, D)   scale folded
        wkv=wqkv[:, D:].astype(bf16),                # (D, 2D)  fused K|V
        bkv=bqkv[:, D:],                             # (1, 2D)
        wo=params["wo_t"].astype(bf16),              # (D, D)
        bo=params["bo"].astype(f32),                 # (1, D)
        w1=params["w1_t"].astype(bf16),              # (D, F)
        b1=params["b1"].astype(f32),                 # (1, F)
        w2=params["w2_t"].astype(bf16),              # (F, D)
        b2=params["b2"].astype(f32),                 # (1, D)
        g1=params["g1"].astype(f32), beta1=params["beta1"].astype(f32),
        g2=params["g2"].astype(f32), beta2=params["beta2"].astype(f32),
    )


def flash_transformer_encoder_layer(src, params, *, nhead, eps=1e-5, q_tile=None):
    """src: (B, S, D) float32. params: dict of f32 weights (x @ W_t + b layout)."""
    B, S, D = src.shape
    assert D % nhead == 0, "d_model must be divisible by nhead"
    F = params["w1_t"].shape[1]
    w = _prepare_weights(params, nhead)

    try:
        vmem_cap = int(pltpu.get_tpu_info().vmem_capacity_bytes)
    except Exception:                     # pragma: no cover (interpret / older jax)
        vmem_cap = 64 * 1024 * 1024
    # Leave headroom for Mosaic internal scratch: ~56 MiB on v7x, ~112 MiB on v5e/v6e.
    vmem_limit = int(max(min(vmem_cap - 8 * 1024 * 1024, 112 * 1024 * 1024),
                         32 * 1024 * 1024))

    if q_tile is None:
        if S % 256 == 0 and vmem_cap >= 100 * 1024 * 1024:
            q_tile = 256                  # v5e/v6e: amortize grid-step overhead
        elif S % 128 == 0:
            q_tile = 128                  # v7x (64 MiB VMEM) / MXU-native rows
        else:
            q_tile = S
    assert S % q_tile == 0
    n_q = S // q_tile

    kernel = functools.partial(encoder_layer_kernel, nhead=nhead, eps=eps)

    flops = 2 * B * (S * D * D            # Q projection
                     + 2 * S * D * D      # K/V projection (once per sequence)
                     + 2 * S * S * D      # scores + PV over all heads
                     + S * D * D          # output projection
                     + 2 * S * D * F)     # FFN
    bytes_accessed = (B * S * D * (4 + 2 + 4)            # src f32 + src bf16 + out
                      + (4 * D * D + 2 * D * F) * 2      # bf16 weights (once)
                      + (9 * D + F + 2 * D) * 4)         # biases + LN params (f32)
    cost = pl.CostEstimate(flops=int(flops),
                           transcendentals=int(B * nhead * S * S),
                           bytes_accessed=int(bytes_accessed))

    def _call(single_buffer_weights):
        def const_spec(shape):
            idx = lambda b, qi: (0,) * len(shape)
            if single_buffer_weights:
                # grid-invariant blocks: single-buffer to halve resident weight VMEM
                return pl.BlockSpec(shape, idx, pipeline_mode=pl.Buffered(1))
            return pl.BlockSpec(shape, idx)

        return pl.pallas_call(
            kernel,
            out_shape=jax.ShapeDtypeStruct((B, S, D), src.dtype),
            grid_spec=pltpu.PrefetchScalarGridSpec(
                num_scalar_prefetch=0,
                grid=(B, n_q),
                in_specs=[
                    pl.BlockSpec((1, q_tile, D), lambda b, qi: (b, qi, 0)),  # xq (f32)
                    pl.BlockSpec((1, S, D), lambda b, qi: (b, 0, 0)),        # xkv (bf16)
                    const_spec((D, D)),       # wq  (scale folded)
                    const_spec((1, D)),       # bq
                    const_spec((D, 2 * D)),   # wkv (fused K|V)
                    const_spec((1, 2 * D)),   # bkv
                    const_spec((D, D)),       # wo
                    const_spec((1, D)),       # bo
                    const_spec((D, F)),       # w1
                    const_spec((1, F)),       # b1
                    const_spec((F, D)),       # w2
                    const_spec((1, D)),       # b2
                    const_spec((1, D)),       # ln1 gamma
                    const_spec((1, D)),       # ln1 beta
                    const_spec((1, D)),       # ln2 gamma
                    const_spec((1, D)),       # ln2 beta
                ],
                out_specs=pl.BlockSpec((1, q_tile, D), lambda b, qi: (b, qi, 0)),
                scratch_shapes=[pltpu.VMEM((S, D), jnp.bfloat16),   # K (bias applied)
                                pltpu.VMEM((S, D), jnp.bfloat16)],  # V (bias applied)
            ),
            compiler_params=pltpu.CompilerParams(
                dimension_semantics=("parallel", "arbitrary"),
                vmem_limit_bytes=vmem_limit),
            cost_estimate=cost,
        )(src, src.astype(jnp.bfloat16),
          w["wq"], w["bq"], w["wkv"], w["bkv"], w["wo"], w["bo"],
          w["w1"], w["b1"], w["w2"], w["b2"],
          w["g1"], w["beta1"], w["g2"], w["beta2"])

    try:
        return _call(True)
    except Exception:
        # pipeline_mode=pl.Buffered(1) unsupported on this jax version:
        # fall back to default double-buffered weights (correctness identical).
        return _call(False)


def reference_jax(src, params, *, nhead, eps=1e-5):
    """Pure-JAX reference using the same bf16-matmul / f32-accumulate recipe
    (and the same scale-folded weights) as the kernel."""
    f32, bf16 = jnp.float32, jnp.bfloat16
    w = _prepare_weights(params, nhead)
    B, S, D = src.shape
    hd = D // nhead
    x = src.astype(f32)
    xb = x.astype(bf16)

    q = jnp.einsum('bsd,de->bse', xb, w["wq"], preferred_element_type=f32) + w["bq"][0]
    kv = jnp.einsum('bsd,de->bse', xb, w["wkv"], preferred_element_type=f32) + w["bkv"][0]
    kv = kv.astype(bf16)
    k, v = kv[..., :D], kv[..., D:]

    qh = q.reshape(B, S, nhead, hd).transpose(0, 2, 1, 3).astype(bf16)
    kh = k.reshape(B, S, nhead, hd).transpose(0, 2, 1, 3)
    vh = v.reshape(B, S, nhead, hd).transpose(0, 2, 1, 3)
    s = jnp.einsum('bhqe,bhke->bhqk', qh, kh, preferred_element_type=f32)
    m = jnp.max(s, -1, keepdims=True)
    p = jnp.exp(s - m)
    l = jnp.sum(p, -1, keepdims=True)
    o = jnp.einsum('bhqk,bhke->bhqe', p.astype(bf16), vh,
                   preferred_element_type=f32) / l
    o = o.transpose(0, 2, 1, 3).reshape(B, S, D).astype(bf16)
    attn = jnp.einsum('bsd,de->bse', o, w["wo"], preferred_element_type=f32) + w["bo"][0]

    def ln(z, g, b):
        mu = jnp.mean(z, -1, keepdims=True)
        c = z - mu
        var = jnp.mean(c * c, -1, keepdims=True)
        return c * jax.lax.rsqrt(var + eps) * g + b

    h = ln(x + attn, w["g1"][0], w["beta1"][0])
    h1 = jnp.maximum(
        jnp.einsum('bsd,df->bsf', h.astype(bf16), w["w1"],
                   preferred_element_type=f32) + w["b1"][0], 0.0)
    ff = jnp.einsum('bsf,fd->bsd', h1.astype(bf16), w["w2"],
                    preferred_element_type=f32) + w["b2"][0]
    return ln(h + ff, w["g2"][0], w["beta2"][0])


def init_params(key, d_model, nhead, dim_feedforward):
    ks = jax.random.split(key, 8)
    scale = 0.02
    return {
        # stored pre-transposed so the math is x @ W_t + b
        "wqkv_t": scale * jax.random.normal(ks[0], (d_model, 3 * d_model), jnp.float32),
        "bqkv":   scale * jax.random.normal(ks[1], (1, 3 * d_model), jnp.float32),
        "wo_t":   scale * jax.random.normal(ks[2], (d_model, d_model), jnp.float32),
        "bo":     scale * jax.random.normal(ks[3], (1, d_model), jnp.float32),
        "w1_t":   scale * jax.random.normal(ks[4], (d_model, dim_feedforward), jnp.float32),
        "b1":     scale * jax.random.normal(ks[5], (1, dim_feedforward), jnp.float32),
        "w2_t":   scale * jax.random.normal(ks[6], (dim_feedforward, d_model), jnp.float32),
        "b2":     scale * jax.random.normal(ks[7], (1, d_model), jnp.float32),
        "g1":     jnp.ones((1, d_model), jnp.float32),
        "beta1":  jnp.zeros((1, d_model), jnp.float32),
        "g2":     jnp.ones((1, d_model), jnp.float32),
        "beta2":  jnp.zeros((1, d_model), jnp.float32),
    }


if __name__ == "__main__":
    # Small shapes: batch=2, seq=8, d_model=32, nhead=4, dim_feedforward=64.
    B, S, D, NHEAD, FF = 2, 8, 32, 4, 64
    key = jax.random.PRNGKey(0)
    k_src, k_par = jax.random.split(key)
    src = jax.random.normal(k_src, (B, S, D), jnp.float32)
    params = init_params(k_par, D, NHEAD, FF)

    out = flash_transformer_encoder_layer(src, params, nhead=NHEAD)
    out = jax.block_until_ready(out)

    ref = reference_jax(src, params, nhead=NHEAD)
    assert out.shape == (B, S, D)
    err = float(jnp.max(jnp.abs(out - ref)))
    assert jnp.allclose(out, ref, atol=2e-2, rtol=2e-2), f"max abs err {err}"
    print("KERNEL_OK")
</pallas_src>

<mosaic_0001>
module attributes {stable_mosaic.version = 11 : i64} {
  func.func @encoder_layer_kernel(%arg0: i32, %arg1: i32, %arg2: memref<1x8x32xf32, #tpu.memory_space<vmem>>, %arg3: memref<1x8x32xbf16, #tpu.memory_space<vmem>>, %arg4: memref<32x32xbf16, #tpu.memory_space<vmem>>, %arg5: memref<1x32xf32, #tpu.memory_space<vmem>>, %arg6: memref<32x64xbf16, #tpu.memory_space<vmem>>, %arg7: memref<1x64xf32, #tpu.memory_space<vmem>>, %arg8: memref<32x32xbf16, #tpu.memory_space<vmem>>, %arg9: memref<1x32xf32, #tpu.memory_space<vmem>>, %arg10: memref<32x64xbf16, #tpu.memory_space<vmem>>, %arg11: memref<1x64xf32, #tpu.memory_space<vmem>>, %arg12: memref<64x32xbf16, #tpu.memory_space<vmem>>, %arg13: memref<1x32xf32, #tpu.memory_space<vmem>>, %arg14: memref<1x32xf32, #tpu.memory_space<vmem>>, %arg15: memref<1x32xf32, #tpu.memory_space<vmem>>, %arg16: memref<1x32xf32, #tpu.memory_space<vmem>>, %arg17: memref<1x32xf32, #tpu.memory_space<vmem>>, %arg18: memref<1x8x32xf32, #tpu.memory_space<vmem>>, %arg19: memref<8x32xbf16, #tpu.memory_space<vmem>>, %arg20: memref<8x32xbf16, #tpu.memory_space<vmem>>) attributes {dimension_semantics = [#tpu.dimension_semantics<parallel>, #tpu.dimension_semantics<arbitrary>], iteration_bounds = array<i64: 2, 1>, scalar_prefetch = 0 : i64, scratch_operands = 2 : i64, tpu.core_type = #tpu.core_type<tc>, window_params = [{transform_indices = @transform_0, window_bounds = array<i64: 1, 8, 32>}, {transform_indices = @transform_1, window_bounds = array<i64: 1, 8, 32>}, {pipeline_mode = #tpu.pipeline_mode<synchronous>, transform_indices = @transform_2, window_bounds = array<i64: 32, 32>}, {pipeline_mode = #tpu.pipeline_mode<synchronous>, transform_indices = @transform_3, window_bounds = array<i64: 1, 32>}, {pipeline_mode = #tpu.pipeline_mode<synchronous>, transform_indices = @transform_4, window_bounds = array<i64: 32, 64>}, {pipeline_mode = #tpu.pipeline_mode<synchronous>, transform_indices = @transform_5, window_bounds = array<i64: 1, 64>}, {pipeline_mode = #tpu.pipeline_mode<synchronous>, transform_indices = @transform_6, window_bounds = array<i64: 32, 32>}, {pipeline_mode = #tpu.pipeline_mode<synchronous>, transform_indices = @transform_7, window_bounds = array<i64: 1, 32>}, {pipeline_mode = #tpu.pipeline_mode<synchronous>, transform_indices = @transform_8, window_bounds = array<i64: 32, 64>}, {pipeline_mode = #tpu.pipeline_mode<synchronous>, transform_indices = @transform_9, window_bounds = array<i64: 1, 64>}, {pipeline_mode = #tpu.pipeline_mode<synchronous>, transform_indices = @transform_10, window_bounds = array<i64: 64, 32>}, {pipeline_mode = #tpu.pipeline_mode<synchronous>, transform_indices = @transform_11, window_bounds = array<i64: 1, 32>}, {pipeline_mode = #tpu.pipeline_mode<synchronous>, transform_indices = @transform_12, window_bounds = array<i64: 1, 32>}, {pipeline_mode = #tpu.pipeline_mode<synchronous>, transform_indices = @transform_13, window_bounds = array<i64: 1, 32>}, {pipeline_mode = #tpu.pipeline_mode<synchronous>, transform_indices = @transform_14, window_bounds = array<i64: 1, 32>}, {pipeline_mode = #tpu.pipeline_mode<synchronous>, transform_indices = @transform_15, window_bounds = array<i64: 1, 32>}, {transform_indices = @transform_16, window_bounds = array<i64: 1, 8, 32>}]} {
    %c0_i32 = arith.constant 0 : i32
    %0 = arith.cmpi eq, %arg1, %c0_i32 : i32
    %1 = arith.extui %0 : i1 to i32
    %c0_i32_0 = arith.constant 0 : i32
    %2 = arith.cmpi ne, %1, %c0_i32_0 : i32
    scf.if %2 {
      %c0_73 = arith.constant 0 : index
      %c0_74 = arith.constant 0 : index
      %c0_75 = arith.constant 0 : index
      %165 = vector.load %arg3[%c0_73, %c0_74, %c0_75] : memref<1x8x32xbf16, #tpu.memory_space<vmem>>, vector<1x8x32xbf16>
      %166 = vector.shape_cast %165 : vector<1x8x32xbf16> to vector<8x32xbf16>
      %c0_76 = arith.constant 0 : index
      %c0_77 = arith.constant 0 : index
      %167 = vector.load %arg6[%c0_76, %c0_77] : memref<32x64xbf16, #tpu.memory_space<vmem>>, vector<32x64xbf16>
      %cst_78 = arith.constant dense<0.000000e+00> : vector<8x64xf32>
      %168 = tpu.matmul %166, %167, %cst_78 {dimension_numbers = #tpu.dot_dimension_numbers<[1], [0], [0], [1], [0, 0, 1, 1], [], []>} : vector<8x32xbf16>, vector<32x64xbf16>, vector<8x64xf32> -> vector<8x64xf32>
      %c0_79 = arith.constant 0 : index
      %c0_80 = arith.constant 0 : index
      %169 = vector.load %arg7[%c0_79, %c0_80] : memref<1x64xf32, #tpu.memory_space<vmem>>, vector<1x64xf32>
      %170 = vector.shape_cast %169 : vector<1x64xf32> to vector<64xf32>
      %171 = vector.shape_cast %170 : vector<64xf32> to vector<1x64xf32>
      %172 = vector.broadcast %171 : vector<1x64xf32> to vector<8x64xf32>
      %173 = arith.addf %168, %172 : vector<8x64xf32>
      %174 = arith.truncf %173 : vector<8x64xf32> to vector<8x64xbf16>
      %175 = vector.extract_strided_slice %174 {offsets = [0, 0], sizes = [8, 32], strides = [1, 1]} : vector<8x64xbf16> to vector<8x32xbf16>
      %c0_81 = arith.constant 0 : index
      %c0_82 = arith.constant 0 : index
      %176 = vector.load %arg19[%c0_81, %c0_82] : memref<8x32xbf16, #tpu.memory_space<vmem>>, vector<8x32xbf16>
      tpu.vector_store %arg19[%c0_81, %c0_82], %175 {strides = array<i32>} : memref<8x32xbf16, #tpu.memory_space<vmem>>, vector<8x32xbf16>,
      %177 = vector.extract_strided_slice %174 {offsets = [0, 32], sizes = [8, 32], strides = [1, 1]} : vector<8x64xbf16> to vector<8x32xbf16>
      %c0_83 = arith.constant 0 : index
      %c0_84 = arith.constant 0 : index
      %178 = vector.load %arg20[%c0_83, %c0_84] : memref<8x32xbf16, #tpu.memory_space<vmem>>, vector<8x32xbf16>
      tpu.vector_store %arg20[%c0_83, %c0_84], %177 {strides = array<i32>} : memref<8x32xbf16, #tpu.memory_space<vmem>>, vector<8x32xbf16>,
    } else {
    }
    %c0 = arith.constant 0 : index
    %c0_1 = arith.constant 0 : index
    %c0_2 = arith.constant 0 : index
    %3 = vector.load %arg2[%c0, %c0_1, %c0_2] : memref<1x8x32xf32, #tpu.memory_space<vmem>>, vector<1x8x32xf32>
    %4 = vector.shape_cast %3 : vector<1x8x32xf32> to vector<8x32xf32>
    %5 = arith.truncf %4 : vector<8x32xf32> to vector<8x32xbf16>
    %c0_3 = arith.constant 0 : index
    %c0_4 = arith.constant 0 : index
    %6 = vector.load %arg4[%c0_3, %c0_4] : memref<32x32xbf16, #tpu.memory_space<vmem>>, vector<32x32xbf16>
    %cst = arith.constant dense<0.000000e+00> : vector<8x32xf32>
    %7 = tpu.matmul %5, %6, %cst {dimension_numbers = #tpu.dot_dimension_numbers<[1], [0], [0], [1], [0, 0, 1, 1], [], []>} : vector<8x32xbf16>, vector<32x32xbf16>, vector<8x32xf32> -> vector<8x32xf32>
    %c0_5 = arith.constant 0 : index
    %c0_6 = arith.constant 0 : index
    %8 = vector.load %arg5[%c0_5, %c0_6] : memref<1x32xf32, #tpu.memory_space<vmem>>, vector<1x32xf32>
    %9 = vector.shape_cast %8 : vector<1x32xf32> to vector<32xf32>
    %10 = vector.shape_cast %9 : vector<32xf32> to vector<1x32xf32>
    %11 = vector.broadcast %10 : vector<1x32xf32> to vector<8x32xf32>
    %12 = arith.addf %7, %11 : vector<8x32xf32>
    %13 = arith.truncf %12 : vector<8x32xf32> to vector<8x32xbf16>
    %c0_7 = arith.constant 0 : index
    %c0_8 = arith.constant 0 : index
    %14 = vector.load %arg19[%c0_7, %c0_8] : memref<8x32xbf16, #tpu.memory_space<vmem>>, vector<8x8xbf16>
    %c0_9 = arith.constant 0 : index
    %c0_10 = arith.constant 0 : index
    %15 = vector.load %arg20[%c0_9, %c0_10] : memref<8x32xbf16, #tpu.memory_space<vmem>>, vector<8x8xbf16>
    %16 = vector.extract_strided_slice %13 {offsets = [0, 0], sizes = [8, 8], strides = [1, 1]} : vector<8x32xbf16> to vector<8x8xbf16>
    %cst_11 = arith.constant dense<0.000000e+00> : vector<8x8xf32>
    %17 = tpu.matmul %16, %14, %cst_11 {dimension_numbers = #tpu.dot_dimension_numbers<[1], [1], [0], [0], [0, 0, 1, 0], [], []>} : vector<8x8xbf16>, vector<8x8xbf16>, vector<8x8xf32> -> vector<8x8xf32>
    %cst_12 = arith.constant dense<0xFF800000> : vector<8xf32>
    %18 = vector.multi_reduction <maximumf>, %17, %cst_12 [1] : vector<8x8xf32> to vector<8xf32>
    %19 = vector.shape_cast %18 : vector<8xf32> to vector<8x1xf32>
    %20 = vector.broadcast %19 : vector<8x1xf32> to vector<8x8xf32>
    %21 = arith.subf %17, %20 : vector<8x8xf32>
    %22 = math.exp %21 : vector<8x8xf32>
    %cst_13 = arith.constant dense<0.000000e+00> : vector<8xf32>
    %23 = vector.multi_reduction <add>, %22, %cst_13 [1] : vector<8x8xf32> to vector<8xf32>
    %24 = vector.shape_cast %23 : vector<8xf32> to vector<8x1xf32>
    %25 = arith.truncf %22 : vector<8x8xf32> to vector<8x8xbf16>
    %cst_14 = arith.constant dense<0.000000e+00> : vector<8x8xf32>
    %26 = tpu.matmul %25, %15, %cst_14 {dimension_numbers = #tpu.dot_dimension_numbers<[1], [0], [0], [1], [0, 0, 1, 1], [], []>} : vector<8x8xbf16>, vector<8x8xbf16>, vector<8x8xf32> -> vector<8x8xf32>
    %27 = tpu.reciprocal %24 {approx = true} : vector<8x1xf32> -> vector<8x1xf32>
    %28 = vector.broadcast %27 : vector<8x1xf32> to vector<8x8xf32>
    %29 = arith.mulf %26, %28 : vector<8x8xf32>
    %30 = arith.truncf %29 : vector<8x8xf32> to vector<8x8xbf16>
    %c0_15 = arith.constant 0 : index
    %c8 = arith.constant 8 : index
    %31 = vector.load %arg19[%c0_15, %c8] : memref<8x32xbf16, #tpu.memory_space<vmem>>, vector<8x8xbf16>
    %c0_16 = arith.constant 0 : index
    %c8_17 = arith.constant 8 : index
    %32 = vector.load %arg20[%c0_16, %c8_17] : memref<8x32xbf16, #tpu.memory_space<vmem>>, vector<8x8xbf16>
    %33 = vector.extract_strided_slice %13 {offsets = [0, 8], sizes = [8, 8], strides = [1, 1]} : vector<8x32xbf16> to vector<8x8xbf16>
    %cst_18 = arith.constant dense<0.000000e+00> : vector<8x8xf32>
    %34 = tpu.matmul %33, %31, %cst_18 {dimension_numbers = #tpu.dot_dimension_numbers<[1], [1], [0], [0], [0, 0, 1, 0], [], []>} : vector<8x8xbf16>, vector<8x8xbf16>, vector<8x8xf32> -> vector<8x8xf32>
    %cst_19 = arith.constant dense<0xFF800000> : vector<8xf32>
    %35 = vector.multi_reduction <maximumf>, %34, %cst_19 [1] : vector<8x8xf32> to vector<8xf32>
    %36 = vector.shape_cast %35 : vector<8xf32> to vector<8x1xf32>
    %37 = vector.broadcast %36 : vector<8x1xf32> to vector<8x8xf32>
    %38 = arith.subf %34, %37 : vector<8x8xf32>
    %39 = math.exp %38 : vector<8x8xf32>
    %cst_20 = arith.constant dense<0.000000e+00> : vector<8xf32>
    %40 = vector.multi_reduction <add>, %39, %cst_20 [1] : vector<8x8xf32> to vector<8xf32>
    %41 = vector.shape_cast %40 : vector<8xf32> to vector<8x1xf32>
    %42 = arith.truncf %39 : vector<8x8xf32> to vector<8x8xbf16>
    %cst_21 = arith.constant dense<0.000000e+00> : vector<8x8xf32>
    %43 = tpu.matmul %42, %32, %cst_21 {dimension_numbers = #tpu.dot_dimension_numbers<[1], [0], [0], [1], [0, 0, 1, 1], [], []>} : vector<8x8xbf16>, vector<8x8xbf16>, vector<8x8xf32> -> vector<8x8xf32>
    %44 = tpu.reciprocal %41 {approx = true} : vector<8x1xf32> -> vector<8x1xf32>
    %45 = vector.broadcast %44 : vector<8x1xf32> to vector<8x8xf32>
    %46 = arith.mulf %43, %45 : vector<8x8xf32>
    %47 = arith.truncf %46 : vector<8x8xf32> to vector<8x8xbf16>
    %c0_22 = arith.constant 0 : index
    %c16 = arith.constant 16 : index
    %48 = vector.load %arg19[%c0_22, %c16] : memref<8x32xbf16, #tpu.memory_space<vmem>>, vector<8x8xbf16>
    %c0_23 = arith.constant 0 : index
    %c16_24 = arith.constant 16 : index
    %49 = vector.load %arg20[%c0_23, %c16_24] : memref<8x32xbf16, #tpu.memory_space<vmem>>, vector<8x8xbf16>
    %50 = vector.extract_strided_slice %13 {offsets = [0, 16], sizes = [8, 8], strides = [1, 1]} : vector<8x32xbf16> to vector<8x8xbf16>
    %cst_25 = arith.constant dense<0.000000e+00> : vector<8x8xf32>
    %51 = tpu.matmul %50, %48, %cst_25 {dimension_numbers = #tpu.dot_dimension_numbers<[1], [1], [0], [0], [0, 0, 1, 0], [], []>} : vector<8x8xbf16>, vector<8x8xbf16>, vector<8x8xf32> -> vector<8x8xf32>
    %cst_26 = arith.constant dense<0xFF800000> : vector<8xf32>
    %52 = vector.multi_reduction <maximumf>, %51, %cst_26 [1] : vector<8x8xf32> to vector<8xf32>
    %53 = vector.shape_cast %52 : vector<8xf32> to vector<8x1xf32>
    %54 = vector.broadcast %53 : vector<8x1xf32> to vector<8x8xf32>
    %55 = arith.subf %51, %54 : vector<8x8xf32>
    %56 = math.exp %55 : vector<8x8xf32>
    %cst_27 = arith.constant dense<0.000000e+00> : vector<8xf32>
    %57 = vector.multi_reduction <add>, %56, %cst_27 [1] : vector<8x8xf32> to vector<8xf32>
    %58 = vector.shape_cast %57 : vector<8xf32> to vector<8x1xf32>
    %59 = arith.truncf %56 : vector<8x8xf32> to vector<8x8xbf16>
    %cst_28 = arith.constant dense<0.000000e+00> : vector<8x8xf32>
    %60 = tpu.matmul %59, %49, %cst_28 {dimension_numbers = #tpu.dot_dimension_numbers<[1], [0], [0], [1], [0, 0, 1, 1], [], []>} : vector<8x8xbf16>, vector<8x8xbf16>, vector<8x8xf32> -> vector<8x8xf32>
    %61 = tpu.reciprocal %58 {approx = true} : vector<8x1xf32> -> vector<8x1xf32>
    %62 = vector.broadcast %61 : vector<8x1xf32> to vector<8x8xf32>
    %63 = arith.mulf %60, %62 : vector<8x8xf32>
    %64 = arith.truncf %63 : vector<8x8xf32> to vector<8x8xbf16>
    %c0_29 = arith.constant 0 : index
    %c24 = arith.constant 24 : index
    %65 = vector.load %arg19[%c0_29, %c24] : memref<8x32xbf16, #tpu.memory_space<vmem>>, vector<8x8xbf16>
    %c0_30 = arith.constant 0 : index
    %c24_31 = arith.constant 24 : index
    %66 = vector.load %arg20[%c0_30, %c24_31] : memref<8x32xbf16, #tpu.memory_space<vmem>>, vector<8x8xbf16>
    %67 = vector.extract_strided_slice %13 {offsets = [0, 24], sizes = [8, 8], strides = [1, 1]} : vector<8x32xbf16> to vector<8x8xbf16>
    %cst_32 = arith.constant dense<0.000000e+00> : vector<8x8xf32>
    %68 = tpu.matmul %67, %65, %cst_32 {dimension_numbers = #tpu.dot_dimension_numbers<[1], [1], [0], [0], [0, 0, 1, 0], [], []>} : vector<8x8xbf16>, vector<8x8xbf16>, vector<8x8xf32> -> vector<8x8xf32>
    %cst_33 = arith.constant dense<0xFF800000> : vector<8xf32>
    %69 = vector.multi_reduction <maximumf>, %68, %cst_33 [1] : vector<8x8xf32> to vector<8xf32>
    %70 = vector.shape_cast %69 : vector<8xf32> to vector<8x1xf32>
    %71 = vector.broadcast %70 : vector<8x1xf32> to vector<8x8xf32>
    %72 = arith.subf %68, %71 : vector<8x8xf32>
    %73 = math.exp %72 : vector<8x8xf32>
    %cst_34 = arith.constant dense<0.000000e+00> : vector<8xf32>
    %74 = vector.multi_reduction <add>, %73, %cst_34 [1] : vector<8x8xf32> to vector<8xf32>
    %75 = vector.shape_cast %74 : vector<8xf32> to vector<8x1xf32>
    %76 = arith.truncf %73 : vector<8x8xf32> to vector<8x8xbf16>
    %cst_35 = arith.constant dense<0.000000e+00> : vector<8x8xf32>
    %77 = tpu.matmul %76, %66, %cst_35 {dimension_numbers = #tpu.dot_dimension_numbers<[1], [0], [0], [1], [0, 0, 1, 1], [], []>} : vector<8x8xbf16>, vector<8x8xbf16>, vector<8x8xf32> -> vector<8x8xf32>
    %78 = tpu.reciprocal %75 {approx = true} : vector<8x1xf32> -> vector<8x1xf32>
    %79 = vector.broadcast %78 : vector<8x1xf32> to vector<8x8xf32>
    %80 = arith.mulf %77, %79 : vector<8x8xf32>
    %81 = arith.truncf %80 : vector<8x8xf32> to vector<8x8xbf16>
    %82 = tpu.concatenate %30, %47, %64, %81 in 1 : vector<8x8xbf16>, vector<8x8xbf16>, vector<8x8xbf16>, vector<8x8xbf16> -> vector<8x32xbf16>
    %c0_36 = arith.constant 0 : index
    %c0_37 = arith.constant 0 : index
    %83 = vector.load %arg8[%c0_36, %c0_37] : memref<32x32xbf16, #tpu.memory_space<vmem>>, vector<32x32xbf16>
    %cst_38 = arith.constant dense<0.000000e+00> : vector<8x32xf32>
    %84 = tpu.matmul %82, %83, %cst_38 {dimension_numbers = #tpu.dot_dimension_numbers<[1], [0], [0], [1], [0, 0, 1, 1], [], []>} : vector<8x32xbf16>, vector<32x32xbf16>, vector<8x32xf32> -> vector<8x32xf32>
    %c0_39 = arith.constant 0 : index
    %c0_40 = arith.constant 0 : index
    %85 = vector.load %arg9[%c0_39, %c0_40] : memref<1x32xf32, #tpu.memory_space<vmem>>, vector<1x32xf32>
    %86 = vector.shape_cast %85 : vector<1x32xf32> to vector<32xf32>
    %87 = vector.shape_cast %86 : vector<32xf32> to vector<1x32xf32>
    %88 = vector.broadcast %87 : vector<1x32xf32> to vector<8x32xf32>
    %89 = arith.addf %84, %88 : vector<8x32xf32>
    %90 = arith.addf %4, %89 : vector<8x32xf32>
    %c0_41 = arith.constant 0 : index
    %c0_42 = arith.constant 0 : index
    %91 = vector.load %arg14[%c0_41, %c0_42] : memref<1x32xf32, #tpu.memory_space<vmem>>, vector<1x32xf32>
    %92 = vector.shape_cast %91 : vector<1x32xf32> to vector<32xf32>
    %c0_43 = arith.constant 0 : index
    %c0_44 = arith.constant 0 : index
    %93 = vector.load %arg15[%c0_43, %c0_44] : memref<1x32xf32, #tpu.memory_space<vmem>>, vector<1x32xf32>
    %94 = vector.shape_cast %93 : vector<1x32xf32> to vector<32xf32>
    %cst_45 = arith.constant dense<0.000000e+00> : vector<8xf32>
    %95 = vector.multi_reduction <add>, %90, %cst_45 [1] : vector<8x32xf32> to vector<8xf32>
    %96 = vector.shape_cast %95 : vector<8xf32> to vector<8x1xf32>
    %cst_46 = arith.constant 3.200000e+01 : f32
    %97 = vector.broadcast %cst_46 : f32 to vector<8x1xf32>
    %98 = arith.divf %96, %97 : vector<8x1xf32>
    %99 = vector.broadcast %98 : vector<8x1xf32> to vector<8x32xf32>
    %100 = arith.subf %90, %99 : vector<8x32xf32>
    %101 = arith.mulf %100, %100 : vector<8x32xf32>
    %cst_47 = arith.constant dense<0.000000e+00> : vector<8xf32>
    %102 = vector.multi_reduction <add>, %101, %cst_47 [1] : vector<8x32xf32> to vector<8xf32>
    %103 = vector.shape_cast %102 : vector<8xf32> to vector<8x1xf32>
    %cst_48 = arith.constant 3.200000e+01 : f32
    %104 = vector.broadcast %cst_48 : f32 to vector<8x1xf32>
    %105 = arith.divf %103, %104 : vector<8x1xf32>
    %cst_49 = arith.constant 9.99999974E-6 : f32
    %106 = vector.broadcast %cst_49 : f32 to vector<8x1xf32>
    %107 = arith.addf %105, %106 : vector<8x1xf32>
    %108 = math.rsqrt %107 : vector<8x1xf32>
    %109 = vector.broadcast %108 : vector<8x1xf32> to vector<8x32xf32>
    %110 = arith.mulf %100, %109 : vector<8x32xf32>
    %111 = vector.shape_cast %92 : vector<32xf32> to vector<1x32xf32>
    %112 = vector.broadcast %111 : vector<1x32xf32> to vector<8x32xf32>
    %113 = arith.mulf %110, %112 : vector<8x32xf32>
    %114 = vector.shape_cast %94 : vector<32xf32> to vector<1x32xf32>
    %115 = vector.broadcast %114 : vector<1x32xf32> to vector<8x32xf32>
    %116 = arith.addf %113, %115 : vector<8x32xf32>
    %117 = arith.truncf %116 : vector<8x32xf32> to vector<8x32xbf16>
    %c0_50 = arith.constant 0 : index
    %c0_51 = arith.constant 0 : index
    %118 = vector.load %arg10[%c0_50, %c0_51] : memref<32x64xbf16, #tpu.memory_space<vmem>>, vector<32x64xbf16>
    %cst_52 = arith.constant dense<0.000000e+00> : vector<8x64xf32>
    %119 = tpu.matmul %117, %118, %cst_52 {dimension_numbers = #tpu.dot_dimension_numbers<[1], [0], [0], [1], [0, 0, 1, 1], [], []>} : vector<8x32xbf16>, vector<32x64xbf16>, vector<8x64xf32> -> vector<8x64xf32>
    %c0_53 = arith.constant 0 : index
    %c0_54 = arith.constant 0 : index
    %120 = vector.load %arg11[%c0_53, %c0_54] : memref<1x64xf32, #tpu.memory_space<vmem>>, vector<1x64xf32>
    %121 = vector.shape_cast %120 : vector<1x64xf32> to vector<64xf32>
    %122 = vector.shape_cast %121 : vector<64xf32> to vector<1x64xf32>
    %123 = vector.broadcast %122 : vector<1x64xf32> to vector<8x64xf32>
    %124 = arith.addf %119, %123 : vector<8x64xf32>
    %cst_55 = arith.constant 0.000000e+00 : f32
    %125 = vector.broadcast %cst_55 : f32 to vector<8x64xf32>
    %126 = arith.maximumf %124, %125 : vector<8x64xf32>
    %127 = arith.truncf %126 : vector<8x64xf32> to vector<8x64xbf16>
    %c0_56 = arith.constant 0 : index
    %c0_57 = arith.constant 0 : index
    %128 = vector.load %arg12[%c0_56, %c0_57] : memref<64x32xbf16, #tpu.memory_space<vmem>>, vector<64x32xbf16>
    %cst_58 = arith.constant dense<0.000000e+00> : vector<8x32xf32>
    %129 = tpu.matmul %127, %128, %cst_58 {dimension_numbers = #tpu.dot_dimension_numbers<[1], [0], [0], [1], [0, 0, 1, 1], [], []>} : vector<8x64xbf16>, vector<64x32xbf16>, vector<8x32xf32> -> vector<8x32xf32>
    %c0_59 = arith.constant 0 : index
    %c0_60 = arith.constant 0 : index
    %130 = vector.load %arg13[%c0_59, %c0_60] : memref<1x32xf32, #tpu.memory_space<vmem>>, vector<1x32xf32>
    %131 = vector.shape_cast %130 : vector<1x32xf32> to vector<32xf32>
    %132 = vector.shape_cast %131 : vector<32xf32> to vector<1x32xf32>
    %133 = vector.broadcast %132 : vector<1x32xf32> to vector<8x32xf32>
    %134 = arith.addf %129, %133 : vector<8x32xf32>
    %135 = arith.addf %116, %134 : vector<8x32xf32>
    %c0_61 = arith.constant 0 : index
    %c0_62 = arith.constant 0 : index
    %136 = vector.load %arg16[%c0_61, %c0_62] : memref<1x32xf32, #tpu.memory_space<vmem>>, vector<1x32xf32>
    %137 = vector.shape_cast %136 : vector<1x32xf32> to vector<32xf32>
    %c0_63 = arith.constant 0 : index
    %c0_64 = arith.constant 0 : index
    %138 = vector.load %arg17[%c0_63, %c0_64] : memref<1x32xf32, #tpu.memory_space<vmem>>, vector<1x32xf32>
    %139 = vector.shape_cast %138 : vector<1x32xf32> to vector<32xf32>
    %cst_65 = arith.constant dense<0.000000e+00> : vector<8xf32>
    %140 = vector.multi_reduction <add>, %135, %cst_65 [1] : vector<8x32xf32> to vector<8xf32>
    %141 = vector.shape_cast %140 : vector<8xf32> to vector<8x1xf32>
    %cst_66 = arith.constant 3.200000e+01 : f32
    %142 = vector.broadcast %cst_66 : f32 to vector<8x1xf32>
    %143 = arith.divf %141, %142 : vector<8x1xf32>
    %144 = vector.broadcast %143 : vector<8x1xf32> to vector<8x32xf32>
    %145 = arith.subf %135, %144 : vector<8x32xf32>
    %146 = arith.mulf %145, %145 : vector<8x32xf32>
    %cst_67 = arith.constant dense<0.000000e+00> : vector<8xf32>
    %147 = vector.multi_reduction <add>, %146, %cst_67 [1] : vector<8x32xf32> to vector<8xf32>
    %148 = vector.shape_cast %147 : vector<8xf32> to vector<8x1xf32>
    %cst_68 = arith.constant 3.200000e+01 : f32
    %149 = vector.broadcast %cst_68 : f32 to vector<8x1xf32>
    %150 = arith.divf %148, %149 : vector<8x1xf32>
    %cst_69 = arith.constant 9.99999974E-6 : f32
    %151 = vector.broadcast %cst_69 : f32 to vector<8x1xf32>
    %152 = arith.addf %150, %151 : vector<8x1xf32>
    %153 = math.rsqrt %152 : vector<8x1xf32>
    %154 = vector.broadcast %153 : vector<8x1xf32> to vector<8x32xf32>
    %155 = arith.mulf %145, %154 : vector<8x32xf32>
    %156 = vector.shape_cast %137 : vector<32xf32> to vector<1x32xf32>
    %157 = vector.broadcast %156 : vector<1x32xf32> to vector<8x32xf32>
    %158 = arith.mulf %155, %157 : vector<8x32xf32>
    %159 = vector.shape_cast %139 : vector<32xf32> to vector<1x32xf32>
    %160 = vector.broadcast %159 : vector<1x32xf32> to vector<8x32xf32>
    %161 = arith.addf %158, %160 : vector<8x32xf32>
    %c0_70 = arith.constant 0 : index
    %c0_71 = arith.constant 0 : index
    %c0_72 = arith.constant 0 : index
    %162 = vector.load %arg18[%c0_70, %c0_71, %c0_72] : memref<1x8x32xf32, #tpu.memory_space<vmem>>, vector<1x8x32xf32>
    %163 = vector.shape_cast %162 : vector<1x8x32xf32> to vector<8x32xf32>
    %164 = vector.shape_cast %161 : vector<8x32xf32> to vector<1x8x32xf32>
    tpu.vector_store %arg18[%c0_70, %c0_71, %c0_72], %164 {strides = array<i32>} : memref<1x8x32xf32, #tpu.memory_space<vmem>>, vector<1x8x32xf32>,
    return
  }
  func.func @transform_0(%arg0: i32, %arg1: i32) -> (i32, i32, i32) {
    %c0_i32 = arith.constant 0 : i32
    %c0_i32_0 = arith.constant 0 : i32
    return %arg0, %arg1, %c0_i32 : i32, i32, i32
  }
  func.func @transform_1(%arg0: i32, %arg1: i32) -> (i32, i32, i32) {
    %c0_i32 = arith.constant 0 : i32
    %c0_i32_0 = arith.constant 0 : i32
    %c0_i32_1 = arith.constant 0 : i32
    return %arg0, %c0_i32, %c0_i32_0 : i32, i32, i32
  }
  func.func @transform_2(%arg0: i32, %arg1: i32) -> (i32, i32) {
    %c0_i32 = arith.constant 0 : i32
    %c0_i32_0 = arith.constant 0 : i32
    %c0_i32_1 = arith.constant 0 : i32
    return %c0_i32, %c0_i32_0 : i32, i32
  }
  func.func @transform_3(%arg0: i32, %arg1: i32) -> (i32, i32) {
    %c0_i32 = arith.constant 0 : i32
    %c0_i32_0 = arith.constant 0 : i32
    %c0_i32_1 = arith.constant 0 : i32
    return %c0_i32, %c0_i32_0 : i32, i32
  }
  func.func @transform_4(%arg0: i32, %arg1: i32) -> (i32, i32) {
    %c0_i32 = arith.constant 0 : i32
    %c0_i32_0 = arith.constant 0 : i32
    %c0_i32_1 = arith.constant 0 : i32
    return %c0_i32, %c0_i32_0 : i32, i32
  }
  func.func @transform_5(%arg0: i32, %arg1: i32) -> (i32, i32) {
    %c0_i32 = arith.constant 0 : i32
    %c0_i32_0 = arith.constant 0 : i32
    %c0_i32_1 = arith.constant 0 : i32
    return %c0_i32, %c0_i32_0 : i32, i32
  }
  func.func @transform_6(%arg0: i32, %arg1: i32) -> (i32, i32) {
    %c0_i32 = arith.constant 0 : i32
    %c0_i32_0 = arith.constant 0 : i32
    %c0_i32_1 = arith.constant 0 : i32
    return %c0_i32, %c0_i32_0 : i32, i32
  }
  func.func @transform_7(%arg0: i32, %arg1: i32) -> (i32, i32) {
    %c0_i32 = arith.constant 0 : i32
    %c0_i32_0 = arith.constant 0 : i32
    %c0_i32_1 = arith.constant 0 : i32
    return %c0_i32, %c0_i32_0 : i32, i32
  }
  func.func @transform_8(%arg0: i32, %arg1: i32) -> (i32, i32) {
    %c0_i32 = arith.constant 0 : i32
    %c0_i32_0 = arith.constant 0 : i32
    %c0_i32_1 = arith.constant 0 : i32
    return %c0_i32, %c0_i32_0 : i32, i32
  }
  func.func @transform_9(%arg0: i32, %arg1: i32) -> (i32, i32) {
    %c0_i32 = arith.constant 0 : i32
    %c0_i32_0 = arith.constant 0 : i32
    %c0_i32_1 = arith.constant 0 : i32
    return %c0_i32, %c0_i32_0 : i32, i32
  }
  func.func @transform_10(%arg0: i32, %arg1: i32) -> (i32, i32) {
    %c0_i32 = arith.constant 0 : i32
    %c0_i32_0 = arith.constant 0 : i32
    %c0_i32_1 = arith.constant 0 : i32
    return %c0_i32, %c0_i32_0 : i32, i32
  }
  func.func @transform_11(%arg0: i32, %arg1: i32) -> (i32, i32) {
    %c0_i32 = arith.constant 0 : i32
    %c0_i32_0 = arith.constant 0 : i32
    %c0_i32_1 = arith.constant 0 : i32
    return %c0_i32, %c0_i32_0 : i32, i32
  }
  func.func @transform_12(%arg0: i32, %arg1: i32) -> (i32, i32) {
    %c0_i32 = arith.constant 0 : i32
    %c0_i32_0 = arith.constant 0 : i32
    %c0_i32_1 = arith.constant 0 : i32
    return %c0_i32, %c0_i32_0 : i32, i32
  }
  func.func @transform_13(%arg0: i32, %arg1: i32) -> (i32, i32) {
    %c0_i32 = arith.constant 0 : i32
    %c0_i32_0 = arith.constant 0 : i32
    %c0_i32_1 = arith.constant 0 : i32
    return %c0_i32, %c0_i32_0 : i32, i32
  }
  func.func @transform_14(%arg0: i32, %arg1: i32) -> (i32, i32) {
    %c0_i32 = arith.constant 0 : i32
    %c0_i32_0 = arith.constant 0 : i32
    %c0_i32_1 = arith.constant 0 : i32
    return %c0_i32, %c0_i32_0 : i32, i32
  }
  func.func @transform_15(%arg0: i32, %arg1: i32) -> (i32, i32) {
    %c0_i32 = arith.constant 0 : i32
    %c0_i32_0 = arith.constant 0 : i32
    %c0_i32_1 = arith.constant 0 : i32
    return %c0_i32, %c0_i32_0 : i32, i32
  }
  func.func @transform_16(%arg0: i32, %arg1: i32) -> (i32, i32, i32) {
    %c0_i32 = arith.constant 0 : i32
    %c0_i32_0 = arith.constant 0 : i32
    return %arg0, %arg1, %c0_i32 : i32, i32, i32
  }
}

module attributes {stable_mosaic.version = 11 : i64} {
  func.func @encoder_layer_kernel(%arg0: i32, %arg1: i32, %arg2: memref<1x8x32xf32, #tpu.memory_space<vmem>>, %arg3: memref<1x8x32xbf16, #tpu.memory_space<vmem>>, %arg4: memref<32x32xbf16, #tpu.memory_space<vmem>>, %arg5: memref<1x32xf32, #tpu.memory_space<vmem>>, %arg6: memref<32x64xbf16, #tpu.memory_space<vmem>>, %arg7: memref<1x64xf32, #tpu.memory_space<vmem>>, %arg8: memref<32x32xbf16, #tpu.memory_space<vmem>>, %arg9: memref<1x32xf32, #tpu.memory_space<vmem>>, %arg10: memref<32x64xbf16, #tpu.memory_space<vmem>>, %arg11: memref<1x64xf32, #tpu.memory_space<vmem>>, %arg12: memref<64x32xbf16, #tpu.memory_space<vmem>>, %arg13: memref<1x32xf32, #tpu.memory_space<vmem>>, %arg14: memref<1x32xf32, #tpu.memory_space<vmem>>, %arg15: memref<1x32xf32, #tpu.memory_space<vmem>>, %arg16: memref<1x32xf32, #tpu.memory_space<vmem>>, %arg17: memref<1x32xf32, #tpu.memory_space<vmem>>, %arg18: memref<1x8x32xf32, #tpu.memory_space<vmem>>, %arg19: memref<8x32xbf16, #tpu.memory_space<vmem>>, %arg20: memref<8x32xbf16, #tpu.memory_space<vmem>>) attributes {dimension_semantics = [#tpu.dimension_semantics<parallel>, #tpu.dimension_semantics<arbitrary>], iteration_bounds = array<i64: 2, 1>, scalar_prefetch = 0 : i64, scratch_operands = 2 : i64, tpu.core_type = #tpu.core_type<tc>, window_params = [{transform_indices = @transform_0, window_bounds = array<i64: 1, 8, 32>}, {transform_indices = @transform_1, window_bounds = array<i64: 1, 8, 32>}, {pipeline_mode = #tpu.pipeline_mode<synchronous>, transform_indices = @transform_2, window_bounds = array<i64: 32, 32>}, {pipeline_mode = #tpu.pipeline_mode<synchronous>, transform_indices = @transform_3, window_bounds = array<i64: 1, 32>}, {pipeline_mode = #tpu.pipeline_mode<synchronous>, transform_indices = @transform_4, window_bounds = array<i64: 32, 64>}, {pipeline_mode = #tpu.pipeline_mode<synchronous>, transform_indices = @transform_5, window_bounds = array<i64: 1, 64>}, {pipeline_mode = #tpu.pipeline_mode<synchronous>, transform_indices = @transform_6, window_bounds = array<i64: 32, 32>}, {pipeline_mode = #tpu.pipeline_mode<synchronous>, transform_indices = @transform_7, window_bounds = array<i64: 1, 32>}, {pipeline_mode = #tpu.pipeline_mode<synchronous>, transform_indices = @transform_8, window_bounds = array<i64: 32, 64>}, {pipeline_mode = #tpu.pipeline_mode<synchronous>, transform_indices = @transform_9, window_bounds = array<i64: 1, 64>}, {pipeline_mode = #tpu.pipeline_mode<synchronous>, transform_indices = @transform_10, window_bounds = array<i64: 64, 32>}, {pipeline_mode = #tpu.pipeline_mode<synchronous>, transform_indices = @transform_11, window_bounds = array<i64: 1, 32>}, {pipeline_mode = #tpu.pipeline_mode<synchronous>, transform_indices = @transform_12, window_bounds = array<i64: 1, 32>}, {pipeline_mode = #tpu.pipeline_mode<synchronous>, transform_indices = @transform_13, window_bounds = array<i64: 1, 32>}, {pipeline_mode = #tpu.pipeline_mode<synchronous>, transform_indices = @transform_14, window_bounds = array<i64: 1, 32>}, {pipeline_mode = #tpu.pipeline_mode<synchronous>, transform_indices = @transform_15, window_bounds = array<i64: 1, 32>}, {transform_indices = @transform_16, window_bounds = array<i64: 1, 8, 32>}]} {
    %c0_i32 = arith.constant 0 : i32
    %0 = arith.cmpi eq, %arg1, %c0_i32 : i32
    %1 = arith.extui %0 : i1 to i32
    %c0_i32_0 = arith.constant 0 : i32
    %2 = arith.cmpi ne, %1, %c0_i32_0 : i32
    scf.if %2 {
      %c0_73 = arith.constant 0 : index
      %c0_74 = arith.constant 0 : index
      %c0_75 = arith.constant 0 : index
      %165 = vector.load %arg3[%c0_73, %c0_74, %c0_75] : memref<1x8x32xbf16, #tpu.memory_space<vmem>>, vector<1x8x32xbf16>
      %166 = vector.shape_cast %165 : vector<1x8x32xbf16> to vector<8x32xbf16>
      %c0_76 = arith.constant 0 : index
      %c0_77 = arith.constant 0 : index
      %167 = vector.load %arg6[%c0_76, %c0_77] : memref<32x64xbf16, #tpu.memory_space<vmem>>, vector<32x64xbf16>
      %cst_78 = arith.constant dense<0.000000e+00> : vector<8x64xf32>
      %168 = tpu.matmul %166, %167, %cst_78 {dimension_numbers = #tpu.dot_dimension_numbers<[1], [0], [0], [1], [0, 0, 1, 1], [], []>} : vector<8x32xbf16>, vector<32x64xbf16>, vector<8x64xf32> -> vector<8x64xf32>
      %c0_79 = arith.constant 0 : index
      %c0_80 = arith.constant 0 : index
      %169 = vector.load %arg7[%c0_79, %c0_80] : memref<1x64xf32, #tpu.memory_space<vmem>>, vector<1x64xf32>
      %170 = vector.shape_cast %169 : vector<1x64xf32> to vector<64xf32>
      %171 = vector.shape_cast %170 : vector<64xf32> to vector<1x64xf32>
      %172 = vector.broadcast %171 : vector<1x64xf32> to vector<8x64xf32>
      %173 = arith.addf %168, %172 : vector<8x64xf32>
      %174 = arith.truncf %173 : vector<8x64xf32> to vector<8x64xbf16>
      %175 = vector.extract_strided_slice %174 {offsets = [0, 0], sizes = [8, 32], strides = [1, 1]} : vector<8x64xbf16> to vector<8x32xbf16>
      %c0_81 = arith.constant 0 : index
      %c0_82 = arith.constant 0 : index
      %176 = vector.load %arg19[%c0_81, %c0_82] : memref<8x32xbf16, #tpu.memory_space<vmem>>, vector<8x32xbf16>
      tpu.vector_store %arg19[%c0_81, %c0_82], %175 {strides = array<i32>} : memref<8x32xbf16, #tpu.memory_space<vmem>>, vector<8x32xbf16>,
      %177 = vector.extract_strided_slice %174 {offsets = [0, 32], sizes = [8, 32], strides = [1, 1]} : vector<8x64xbf16> to vector<8x32xbf16>
      %c0_83 = arith.constant 0 : index
      %c0_84 = arith.constant 0 : index
      %178 = vector.load %arg20[%c0_83, %c0_84] : memref<8x32xbf16, #tpu.memory_space<vmem>>, vector<8x32xbf16>
      tpu.vector_store %arg20[%c0_83, %c0_84], %177 {strides = array<i32>} : memref<8x32xbf16, #tpu.memory_space<vmem>>, vector<8x32xbf16>,
    } else {
    }
    %c0 = arith.constant 0 : index
    %c0_1 = arith.constant 0 : index
    %c0_2 = arith.constant 0 : index
    %3 = vector.load %arg2[%c0, %c0_1, %c0_2] : memref<1x8x32xf32, #tpu.memory_space<vmem>>, vector<1x8x32xf32>
    %4 = vector.shape_cast %3 : vector<1x8x32xf32> to vector<8x32xf32>
    %5 = arith.truncf %4 : vector<8x32xf32> to vector<8x32xbf16>
    %c0_3 = arith.constant 0 : index
    %c0_4 = arith.constant 0 : index
    %6 = vector.load %arg4[%c0_3, %c0_4] : memref<32x32xbf16, #tpu.memory_space<vmem>>, vector<32x32xbf16>
    %cst = arith.constant dense<0.000000e+00> : vector<8x32xf32>
    %7 = tpu.matmul %5, %6, %cst {dimension_numbers = #tpu.dot_dimension_numbers<[1], [0], [0], [1], [0, 0, 1, 1], [], []>} : vector<8x32xbf16>, vector<32x32xbf16>, vector<8x32xf32> -> vector<8x32xf32>
    %c0_5 = arith.constant 0 : index
    %c0_6 = arith.constant 0 : index
    %8 = vector.load %arg5[%c0_5, %c0_6] : memref<1x32xf32, #tpu.memory_space<vmem>>, vector<1x32xf32>
    %9 = vector.shape_cast %8 : vector<1x32xf32> to vector<32xf32>
    %10 = vector.shape_cast %9 : vector<32xf32> to vector<1x32xf32>
    %11 = vector.broadcast %10 : vector<1x32xf32> to vector<8x32xf32>
    %12 = arith.addf %7, %11 : vector<8x32xf32>
    %13 = arith.truncf %12 : vector<8x32xf32> to vector<8x32xbf16>
    %c0_7 = arith.constant 0 : index
    %c0_8 = arith.constant 0 : index
    %14 = vector.load %arg19[%c0_7, %c0_8] : memref<8x32xbf16, #tpu.memory_space<vmem>>, vector<8x8xbf16>
    %c0_9 = arith.constant 0 : index
    %c0_10 = arith.constant 0 : index
    %15 = vector.load %arg20[%c0_9, %c0_10] : memref<8x32xbf16, #tpu.memory_space<vmem>>, vector<8x8xbf16>
    %16 = vector.extract_strided_slice %13 {offsets = [0, 0], sizes = [8, 8], strides = [1, 1]} : vector<8x32xbf16> to vector<8x8xbf16>
    %cst_11 = arith.constant dense<0.000000e+00> : vector<8x8xf32>
    %17 = tpu.matmul %16, %14, %cst_11 {dimension_numbers = #tpu.dot_dimension_numbers<[1], [1], [0], [0], [0, 0, 1, 0], [], []>} : vector<8x8xbf16>, vector<8x8xbf16>, vector<8x8xf32> -> vector<8x8xf32>
    %cst_12 = arith.constant dense<0xFF800000> : vector<8xf32>
    %18 = vector.multi_reduction <maximumf>, %17, %cst_12 [1] : vector<8x8xf32> to vector<8xf32>
    %19 = vector.shape_cast %18 : vector<8xf32> to vector<8x1xf32>
    %20 = vector.broadcast %19 : vector<8x1xf32> to vector<8x8xf32>
    %21 = arith.subf %17, %20 : vector<8x8xf32>
    %22 = math.exp %21 : vector<8x8xf32>
    %cst_13 = arith.constant dense<0.000000e+00> : vector<8xf32>
    %23 = vector.multi_reduction <add>, %22, %cst_13 [1] : vector<8x8xf32> to vector<8xf32>
    %24 = vector.shape_cast %23 : vector<8xf32> to vector<8x1xf32>
    %25 = arith.truncf %22 : vector<8x8xf32> to vector<8x8xbf16>
    %cst_14 = arith.constant dense<0.000000e+00> : vector<8x8xf32>
    %26 = tpu.matmul %25, %15, %cst_14 {dimension_numbers = #tpu.dot_dimension_numbers<[1], [0], [0], [1], [0, 0, 1, 1], [], []>} : vector<8x8xbf16>, vector<8x8xbf16>, vector<8x8xf32> -> vector<8x8xf32>
    %27 = tpu.reciprocal %24 {approx = true} : vector<8x1xf32> -> vector<8x1xf32>
    %28 = vector.broadcast %27 : vector<8x1xf32> to vector<8x8xf32>
    %29 = arith.mulf %26, %28 : vector<8x8xf32>
    %30 = arith.truncf %29 : vector<8x8xf32> to vector<8x8xbf16>
    %c0_15 = arith.constant 0 : index
    %c8 = arith.constant 8 : index
    %31 = vector.load %arg19[%c0_15, %c8] : memref<8x32xbf16, #tpu.memory_space<vmem>>, vector<8x8xbf16>
    %c0_16 = arith.constant 0 : index
    %c8_17 = arith.constant 8 : index
    %32 = vector.load %arg20[%c0_16, %c8_17] : memref<8x32xbf16, #tpu.memory_space<vmem>>, vector<8x8xbf16>
    %33 = vector.extract_strided_slice %13 {offsets = [0, 8], sizes = [8, 8], strides = [1, 1]} : vector<8x32xbf16> to vector<8x8xbf16>
    %cst_18 = arith.constant dense<0.000000e+00> : vector<8x8xf32>
    %34 = tpu.matmul %33, %31, %cst_18 {dimension_numbers = #tpu.dot_dimension_numbers<[1], [1], [0], [0], [0, 0, 1, 0], [], []>} : vector<8x8xbf16>, vector<8x8xbf16>, vector<8x8xf32> -> vector<8x8xf32>
    %cst_19 = arith.constant dense<0xFF800000> : vector<8xf32>
    %35 = vector.multi_reduction <maximumf>, %34, %cst_19 [1] : vector<8x8xf32> to vector<8xf32>
    %36 = vector.shape_cast %35 : vector<8xf32> to vector<8x1xf32>
    %37 = vector.broadcast %36 : vector<8x1xf32> to vector<8x8xf32>
    %38 = arith.subf %34, %37 : vector<8x8xf32>
    %39 = math.exp %38 : vector<8x8xf32>
    %cst_20 = arith.constant dense<0.000000e+00> : vector<8xf32>
    %40 = vector.multi_reduction <add>, %39, %cst_20 [1] : vector<8x8xf32> to vector<8xf32>
    %41 = vector.shape_cast %40 : vector<8xf32> to vector<8x1xf32>
    %42 = arith.truncf %39 : vector<8x8xf32> to vector<8x8xbf16>
    %cst_21 = arith.constant dense<0.000000e+00> : vector<8x8xf32>
    %43 = tpu.matmul %42, %32, %cst_21 {dimension_numbers = #tpu.dot_dimension_numbers<[1], [0], [0], [1], [0, 0, 1, 1], [], []>} : vector<8x8xbf16>, vector<8x8xbf16>, vector<8x8xf32> -> vector<8x8xf32>
    %44 = tpu.reciprocal %41 {approx = true} : vector<8x1xf32> -> vector<8x1xf32>
    %45 = vector.broadcast %44 : vector<8x1xf32> to vector<8x8xf32>
    %46 = arith.mulf %43, %45 : vector<8x8xf32>
    %47 = arith.truncf %46 : vector<8x8xf32> to vector<8x8xbf16>
    %c0_22 = arith.constant 0 : index
    %c16 = arith.constant 16 : index
    %48 = vector.load %arg19[%c0_22, %c16] : memref<8x32xbf16, #tpu.memory_space<vmem>>, vector<8x8xbf16>
    %c0_23 = arith.constant 0 : index
    %c16_24 = arith.constant 16 : index
    %49 = vector.load %arg20[%c0_23, %c16_24] : memref<8x32xbf16, #tpu.memory_space<vmem>>, vector<8x8xbf16>
    %50 = vector.extract_strided_slice %13 {offsets = [0, 16], sizes = [8, 8], strides = [1, 1]} : vector<8x32xbf16> to vector<8x8xbf16>
    %cst_25 = arith.constant dense<0.000000e+00> : vector<8x8xf32>
    %51 = tpu.matmul %50, %48, %cst_25 {dimension_numbers = #tpu.dot_dimension_numbers<[1], [1], [0], [0], [0, 0, 1, 0], [], []>} : vector<8x8xbf16>, vector<8x8xbf16>, vector<8x8xf32> -> vector<8x8xf32>
    %cst_26 = arith.constant dense<0xFF800000> : vector<8xf32>
    %52 = vector.multi_reduction <maximumf>, %51, %cst_26 [1] : vector<8x8xf32> to vector<8xf32>
    %53 = vector.shape_cast %52 : vector<8xf32> to vector<8x1xf32>
    %54 = vector.broadcast %53 : vector<8x1xf32> to vector<8x8xf32>
    %55 = arith.subf %51, %54 : vector<8x8xf32>
    %56 = math.exp %55 : vector<8x8xf32>
    %cst_27 = arith.constant dense<0.000000e+00> : vector<8xf32>
    %57 = vector.multi_reduction <add>, %56, %cst_27 [1] : vector<8x8xf32> to vector<8xf32>
    %58 = vector.shape_cast %57 : vector<8xf32> to vector<8x1xf32>
    %59 = arith.truncf %56 : vector<8x8xf32> to vector<8x8xbf16>
    %cst_28 = arith.constant dense<0.000000e+00> : vector<8x8xf32>
    %60 = tpu.matmul %59, %49, %cst_28 {dimension_numbers = #tpu.dot_dimension_numbers<[1], [0], [0], [1], [0, 0, 1, 1], [], []>} : vector<8x8xbf16>, vector<8x8xbf16>, vector<8x8xf32> -> vector<8x8xf32>
    %61 = tpu.reciprocal %58 {approx = true} : vector<8x1xf32> -> vector<8x1xf32>
    %62 = vector.broadcast %61 : vector<8x1xf32> to vector<8x8xf32>
    %63 = arith.mulf %60, %62 : vector<8x8xf32>
    %64 = arith.truncf %63 : vector<8x8xf32> to vector<8x8xbf16>
    %c0_29 = arith.constant 0 : index
    %c24 = arith.constant 24 : index
    %65 = vector.load %arg19[%c0_29, %c24] : memref<8x32xbf16, #tpu.memory_space<vmem>>, vector<8x8xbf16>
    %c0_30 = arith.constant 0 : index
    %c24_31 = arith.constant 24 : index
    %66 = vector.load %arg20[%c0_30, %c24_31] : memref<8x32xbf16, #tpu.memory_space<vmem>>, vector<8x8xbf16>
    %67 = vector.extract_strided_slice %13 {offsets = [0, 24], sizes = [8, 8], strides = [1, 1]} : vector<8x32xbf16> to vector<8x8xbf16>
    %cst_32 = arith.constant dense<0.000000e+00> : vector<8x8xf32>
    %68 = tpu.matmul %67, %65, %cst_32 {dimension_numbers = #tpu.dot_dimension_numbers<[1], [1], [0], [0], [0, 0, 1, 0], [], []>} : vector<8x8xbf16>, vector<8x8xbf16>, vector<8x8xf32> -> vector<8x8xf32>
    %cst_33 = arith.constant dense<0xFF800000> : vector<8xf32>
    %69 = vector.multi_reduction <maximumf>, %68, %cst_33 [1] : vector<8x8xf32> to vector<8xf32>
    %70 = vector.shape_cast %69 : vector<8xf32> to vector<8x1xf32>
    %71 = vector.broadcast %70 : vector<8x1xf32> to vector<8x8xf32>
    %72 = arith.subf %68, %71 : vector<8x8xf32>
    %73 = math.exp %72 : vector<8x8xf32>
    %cst_34 = arith.constant dense<0.000000e+00> : vector<8xf32>
    %74 = vector.multi_reduction <add>, %73, %cst_34 [1] : vector<8x8xf32> to vector<8xf32>
    %75 = vector.shape_cast %74 : vector<8xf32> to vector<8x1xf32>
    %76 = arith.truncf %73 : vector<8x8xf32> to vector<8x8xbf16>
    %cst_35 = arith.constant dense<0.000000e+00> : vector<8x8xf32>
    %77 = tpu.matmul %76, %66, %cst_35 {dimension_numbers = #tpu.dot_dimension_numbers<[1], [0], [0], [1], [0, 0, 1, 1], [], []>} : vector<8x8xbf16>, vector<8x8xbf16>, vector<8x8xf32> -> vector<8x8xf32>
    %78 = tpu.reciprocal %75 {approx = true} : vector<8x1xf32> -> vector<8x1xf32>
    %79 = vector.broadcast %78 : vector<8x1xf32> to vector<8x8xf32>
    %80 = arith.mulf %77, %79 : vector<8x8xf32>
    %81 = arith.truncf %80 : vector<8x8xf32> to vector<8x8xbf16>
    %82 = tpu.concatenate %30, %47, %64, %81 in 1 : vector<8x8xbf16>, vector<8x8xbf16>, vector<8x8xbf16>, vector<8x8xbf16> -> vector<8x32xbf16>
    %c0_36 = arith.constant 0 : index
    %c0_37 = arith.constant 0 : index
    %83 = vector.load %arg8[%c0_36, %c0_37] : memref<32x32xbf16, #tpu.memory_space<vmem>>, vector<32x32xbf16>
    %cst_38 = arith.constant dense<0.000000e+00> : vector<8x32xf32>
    %84 = tpu.matmul %82, %83, %cst_38 {dimension_numbers = #tpu.dot_dimension_numbers<[1], [0], [0], [1], [0, 0, 1, 1], [], []>} : vector<8x32xbf16>, vector<32x32xbf16>, vector<8x32xf32> -> vector<8x32xf32>
    %c0_39 = arith.constant 0 : index
    %c0_40 = arith.constant 0 : index
    %85 = vector.load %arg9[%c0_39, %c0_40] : memref<1x32xf32, #tpu.memory_space<vmem>>, vector<1x32xf32>
    %86 = vector.shape_cast %85 : vector<1x32xf32> to vector<32xf32>
    %87 = vector.shape_cast %86 : vector<32xf32> to vector<1x32xf32>
    %88 = vector.broadcast %87 : vector<1x32xf32> to vector<8x32xf32>
    %89 = arith.addf %84, %88 : vector<8x32xf32>
    %90 = arith.addf %4, %89 : vector<8x32xf32>
    %c0_41 = arith.constant 0 : index
    %c0_42 = arith.constant 0 : index
    %91 = vector.load %arg14[%c0_41, %c0_42] : memref<1x32xf32, #tpu.memory_space<vmem>>, vector<1x32xf32>
    %92 = vector.shape_cast %91 : vector<1x32xf32> to vector<32xf32>
    %c0_43 = arith.constant 0 : index
    %c0_44 = arith.constant 0 : index
    %93 = vector.load %arg15[%c0_43, %c0_44] : memref<1x32xf32, #tpu.memory_space<vmem>>, vector<1x32xf32>
    %94 = vector.shape_cast %93 : vector<1x32xf32> to vector<32xf32>
    %cst_45 = arith.constant dense<0.000000e+00> : vector<8xf32>
    %95 = vector.multi_reduction <add>, %90, %cst_45 [1] : vector<8x32xf32> to vector<8xf32>
    %96 = vector.shape_cast %95 : vector<8xf32> to vector<8x1xf32>
    %cst_46 = arith.constant 3.200000e+01 : f32
    %97 = vector.broadcast %cst_46 : f32 to vector<8x1xf32>
    %98 = arith.divf %96, %97 : vector<8x1xf32>
    %99 = vector.broadcast %98 : vector<8x1xf32> to vector<8x32xf32>
    %100 = arith.subf %90, %99 : vector<8x32xf32>
    %101 = arith.mulf %100, %100 : vector<8x32xf32>
    %cst_47 = arith.constant dense<0.000000e+00> : vector<8xf32>
    %102 = vector.multi_reduction <add>, %101, %cst_47 [1] : vector<8x32xf32> to vector<8xf32>
    %103 = vector.shape_cast %102 : vector<8xf32> to vector<8x1xf32>
    %cst_48 = arith.constant 3.200000e+01 : f32
    %104 = vector.broadcast %cst_48 : f32 to vector<8x1xf32>
    %105 = arith.divf %103, %104 : vector<8x1xf32>
    %cst_49 = arith.constant 9.99999974E-6 : f32
    %106 = vector.broadcast %cst_49 : f32 to vector<8x1xf32>
    %107 = arith.addf %105, %106 : vector<8x1xf32>
    %108 = math.rsqrt %107 : vector<8x1xf32>
    %109 = vector.broadcast %108 : vector<8x1xf32> to vector<8x32xf32>
    %110 = arith.mulf %100, %109 : vector<8x32xf32>
    %111 = vector.shape_cast %92 : vector<32xf32> to vector<1x32xf32>
    %112 = vector.broadcast %111 : vector<1x32xf32> to vector<8x32xf32>
    %113 = arith.mulf %110, %112 : vector<8x32xf32>
    %114 = vector.shape_cast %94 : vector<32xf32> to vector<1x32xf32>
    %115 = vector.broadcast %114 : vector<1x32xf32> to vector<8x32xf32>
    %116 = arith.addf %113, %115 : vector<8x32xf32>
    %117 = arith.truncf %116 : vector<8x32xf32> to vector<8x32xbf16>
    %c0_50 = arith.constant 0 : index
    %c0_51 = arith.constant 0 : index
    %118 = vector.load %arg10[%c0_50, %c0_51] : memref<32x64xbf16, #tpu.memory_space<vmem>>, vector<32x64xbf16>
    %cst_52 = arith.constant dense<0.000000e+00> : vector<8x64xf32>
    %119 = tpu.matmul %117, %118, %cst_52 {dimension_numbers = #tpu.dot_dimension_numbers<[1], [0], [0], [1], [0, 0, 1, 1], [], []>} : vector<8x32xbf16>, vector<32x64xbf16>, vector<8x64xf32> -> vector<8x64xf32>
    %c0_53 = arith.constant 0 : index
    %c0_54 = arith.constant 0 : index
    %120 = vector.load %arg11[%c0_53, %c0_54] : memref<1x64xf32, #tpu.memory_space<vmem>>, vector<1x64xf32>
    %121 = vector.shape_cast %120 : vector<1x64xf32> to vector<64xf32>
    %122 = vector.shape_cast %121 : vector<64xf32> to vector<1x64xf32>
    %123 = vector.broadcast %122 : vector<1x64xf32> to vector<8x64xf32>
    %124 = arith.addf %119, %123 : vector<8x64xf32>
    %cst_55 = arith.constant 0.000000e+00 : f32
    %125 = vector.broadcast %cst_55 : f32 to vector<8x64xf32>
    %126 = arith.maximumf %124, %125 : vector<8x64xf32>
    %127 = arith.truncf %126 : vector<8x64xf32> to vector<8x64xbf16>
    %c0_56 = arith.constant 0 : index
    %c0_57 = arith.constant 0 : index
    %128 = vector.load %arg12[%c0_56, %c0_57] : memref<64x32xbf16, #tpu.memory_space<vmem>>, vector<64x32xbf16>
    %cst_58 = arith.constant dense<0.000000e+00> : vector<8x32xf32>
    %129 = tpu.matmul %127, %128, %cst_58 {dimension_numbers = #tpu.dot_dimension_numbers<[1], [0], [0], [1], [0, 0, 1, 1], [], []>} : vector<8x64xbf16>, vector<64x32xbf16>, vector<8x32xf32> -> vector<8x32xf32>
    %c0_59 = arith.constant 0 : index
    %c0_60 = arith.constant 0 : index
    %130 = vector.load %arg13[%c0_59, %c0_60] : memref<1x32xf32, #tpu.memory_space<vmem>>, vector<1x32xf32>
    %131 = vector.shape_cast %130 : vector<1x32xf32> to vector<32xf32>
    %132 = vector.shape_cast %131 : vector<32xf32> to vector<1x32xf32>
    %133 = vector.broadcast %132 : vector<1x32xf32> to vector<8x32xf32>
    %134 = arith.addf %129, %133 : vector<8x32xf32>
    %135 = arith.addf %116, %134 : vector<8x32xf32>
    %c0_61 = arith.constant 0 : index
    %c0_62 = arith.constant 0 : index
    %136 = vector.load %arg16[%c0_61, %c0_62] : memref<1x32xf32, #tpu.memory_space<vmem>>, vector<1x32xf32>
    %137 = vector.shape_cast %136 : vector<1x32xf32> to vector<32xf32>
    %c0_63 = arith.constant 0 : index
    %c0_64 = arith.constant 0 : index
    %138 = vector.load %arg17[%c0_63, %c0_64] : memref<1x32xf32, #tpu.memory_space<vmem>>, vector<1x32xf32>
    %139 = vector.shape_cast %138 : vector<1x32xf32> to vector<32xf32>
    %cst_65 = arith.constant dense<0.000000e+00> : vector<8xf32>
    %140 = vector.multi_reduction <add>, %135, %cst_65 [1] : vector<8x32xf32> to vector<8xf32>
    %141 = vector.shape_cast %140 : vector<8xf32> to vector<8x1xf32>
    %cst_66 = arith.constant 3.200000e+01 : f32
    %142 = vector.broadcast %cst_66 : f32 to vector<8x1xf32>
    %143 = arith.divf %141, %142 : vector<8x1xf32>
    %144 = vector.broadcast %143 : vector<8x1xf32> to vector<8x32xf32>
    %145 = arith.subf %135, %144 : vector<8x32xf32>
    %146 = arith.mulf %145, %145 : vector<8x32xf32>
    %cst_67 = arith.constant dense<0.000000e+00> : vector<8xf32>
    %147 = vector.multi_reduction <add>, %146, %cst_67 [1] : vector<8x32xf32> to vector<8xf32>
    %148 = vector.shape_cast %147 : vector<8xf32> to vector<8x1xf32>
    %cst_68 = arith.constant 3.200000e+01 : f32
    %149 = vector.broadcast %cst_68 : f32 to vector<8x1xf32>
    %150 = arith.divf %148, %149 : vector<8x1xf32>
    %cst_69 = arith.constant 9.99999974E-6 : f32
    %151 = vector.broadcast %cst_69 : f32 to vector<8x1xf32>
    %152 = arith.addf %150, %151 : vector<8x1xf32>
    %153 = math.rsqrt %152 : vector<8x1xf32>
    %154 = vector.broadcast %153 : vector<8x1xf32> to vector<8x32xf32>
    %155 = arith.mulf %145, %154 : vector<8x32xf32>
    %156 = vector.shape_cast %137 : vector<32xf32> to vector<1x32xf32>
    %157 = vector.broadcast %156 : vector<1x32xf32> to vector<8x32xf32>
    %158 = arith.mulf %155, %157 : vector<8x32xf32>
    %159 = vector.shape_cast %139 : vector<32xf32> to vector<1x32xf32>
    %160 = vector.broadcast %159 : vector<1x32xf32> to vector<8x32xf32>
    %161 = arith.addf %158, %160 : vector<8x32xf32>
    %c0_70 = arith.constant 0 : index
    %c0_71 = arith.constant 0 : index
    %c0_72 = arith.constant 0 : index
    %162 = vector.load %arg18[%c0_70, %c0_71, %c0_72] : memref<1x8x32xf32, #tpu.memory_space<vmem>>, vector<1x8x32xf32>
    %163 = vector.shape_cast %162 : vector<1x8x32xf32> to vector<8x32xf32>
    %164 = vector.shape_cast %161 : vector<8x32xf32> to vector<1x8x32xf32>
    tpu.vector_store %arg18[%c0_70, %c0_71, %c0_72], %164 {strides = array<i32>} : memref<1x8x32xf32, #tpu.memory_space<vmem>>, vector<1x8x32xf32>,
    return
  }
  func.func @transform_0(%arg0: i32, %arg1: i32) -> (i32, i32, i32) {
    %c0_i32 = arith.constant 0 : i32
    %c0_i32_0 = arith.constant 0 : i32
    return %arg0, %arg1, %c0_i32 : i32, i32, i32
  }
  func.func @transform_1(%arg0: i32, %arg1: i32) -> (i32, i32, i32) {
    %c0_i32 = arith.constant 0 : i32
    %c0_i32_0 = arith.constant 0 : i32
    %c0_i32_1 = arith.constant 0 : i32
    return %arg0, %c0_i32, %c0_i32_0 : i32, i32, i32
  }
  func.func @transform_2(%arg0: i32, %arg1: i32) -> (i32, i32) {
    %c0_i32 = arith.constant 0 : i32
    %c0_i32_0 = arith.constant 0 : i32
    %c0_i32_1 = arith.constant 0 : i32
    return %c0_i32, %c0_i32_0 : i32, i32
  }
  func.func @transform_3(%arg0: i32, %arg1: i32) -> (i32, i32) {
    %c0_i32 = arith.constant 0 : i32
    %c0_i32_0 = arith.constant 0 : i32
    %c0_i32_1 = arith.constant 0 : i32
    return %c0_i32, %c0_i32_0 : i32, i32
  }
  func.func @transform_4(%arg0: i32, %arg1: i32) -> (i32, i32) {
    %c0_i32 = arith.constant 0 : i32
    %c0_i32_0 = arith.constant 0 : i32
    %c0_i32_1 = arith.constant 0 : i32
    return %c0_i32, %c0_i32_0 : i32, i32
  }
  func.func @transform_5(%arg0: i32, %arg1: i32) -> (i32, i32) {
    %c0_i32 = arith.constant 0 : i32
    %c0_i32_0 = arith.constant 0 : i32
    %c0_i32_1 = arith.constant 0 : i32
    return %c0_i32, %c0_i32_0 : i32, i32
  }
  func.func @transform_6(%arg0: i32, %arg1: i32) -> (i32, i32) {
    %c0_i32 = arith.constant 0 : i32
    %c0_i32_0 = arith.constant 0 : i32
    %c0_i32_1 = arith.constant 0 : i32
    return %c0_i32, %c0_i32_0 : i32, i32
  }
  func.func @transform_7(%arg0: i32, %arg1: i32) -> (i32, i32) {
    %c0_i32 = arith.constant 0 : i32
    %c0_i32_0 = arith.constant 0 : i32
    %c0_i32_1 = arith.constant 0 : i32
    return %c0_i32, %c0_i32_0 : i32, i32
  }
  func.func @transform_8(%arg0: i32, %arg1: i32) -> (i32, i32) {
    %c0_i32 = arith.constant 0 : i32
    %c0_i32_0 = arith.constant 0 : i32
    %c0_i32_1 = arith.constant 0 : i32
    return %c0_i32, %c0_i32_0 : i32, i32
  }
  func.func @transform_9(%arg0: i32, %arg1: i32) -> (i32, i32) {
    %c0_i32 = arith.constant 0 : i32
    %c0_i32_0 = arith.constant 0 : i32
    %c0_i32_1 = arith.constant 0 : i32
    return %c0_i32, %c0_i32_0 : i32, i32
  }
  func.func @transform_10(%arg0: i32, %arg1: i32) -> (i32, i32) {
    %c0_i32 = arith.constant 0 : i32
    %c0_i32_0 = arith.constant 0 : i32
    %c0_i32_1 = arith.constant 0 : i32
    return %c0_i32, %c0_i32_0 : i32, i32
  }
  func.func @transform_11(%arg0: i32, %arg1: i32) -> (i32, i32) {
    %c0_i32 = arith.constant 0 : i32
    %c0_i32_0 = arith.constant 0 : i32
    %c0_i32_1 = arith.constant 0 : i32
    return %c0_i32, %c0_i32_0 : i32, i32
  }
  func.func @transform_12(%arg0: i32, %arg1: i32) -> (i32, i32) {
    %c0_i32 = arith.constant 0 : i32
    %c0_i32_0 = arith.constant 0 : i32
    %c0_i32_1 = arith.constant 0 : i32
    return %c0_i32, %c0_i32_0 : i32, i32
  }
  func.func @transform_13(%arg0: i32, %arg1: i32) -> (i32, i32) {
    %c0_i32 = arith.constant 0 : i32
    %c0_i32_0 = arith.constant 0 : i32
    %c0_i32_1 = arith.constant 0 : i32
    return %c0_i32, %c0_i32_0 : i32, i32
  }
  func.func @transform_14(%arg0: i32, %arg1: i32) -> (i32, i32) {
    %c0_i32 = arith.constant 0 : i32
    %c0_i32_0 = arith.constant 0 : i32
    %c0_i32_1 = arith.constant 0 : i32
    return %c0_i32, %c0_i32_0 : i32, i32
  }
  func.func @transform_15(%arg0: i32, %arg1: i32) -> (i32, i32) {
    %c0_i32 = arith.constant 0 : i32
    %c0_i32_0 = arith.constant 0 : i32
    %c0_i32_1 = arith.constant 0 : i32
    return %c0_i32, %c0_i32_0 : i32, i32
  }
  func.func @transform_16(%arg0: i32, %arg1: i32) -> (i32, i32, i32) {
    %c0_i32 = arith.constant 0 : i32
    %c0_i32_0 = arith.constant 0 : i32
    return %arg0, %arg1, %c0_i32 : i32, i32, i32
  }
}

</mosaic_0001>

<bundles_post_ra>
// kernel: tpu_custom_call.1
= control target key start
LH: loop header
LB: loop body
LE: loop exit
PB: predicated region body
PF: predicated region fallthrough
CT: control target
= control target key end

     0   :  { %s2621_s0 = inlined_call_operand.vmem [shape: f32[2,8,32], index: 0, kind: input, shape index: {}]   ;;  %s2622_s1 = inlined_call_operand.hbm [shape: bf16[2,8,32], index: 1, kind: input, shape index: {}]   ;;  %s2623_s2 = inlined_call_operand.vmem [shape: bf16[32,32], index: 2, kind: input, shape index: {}]   ;;  %s2624_s3 = inlined_call_operand.vmem [shape: f32[1,32], index: 3, kind: input, shape index: {}]   ;;  %s2625_s4 = inlined_call_operand.vmem [shape: bf16[32,64], index: 4, kind: input, shape index: {}]   ;;  %s2626_s5 = inlined_call_operand.vmem [shape: f32[1,64], index: 5, kind: input, shape index: {}]   ;;  %s2627_s6 = inlined_call_operand.hbm [shape: bf16[32,32], index: 6, kind: input, shape index: {}]   ;;  %s2628_s7 = inlined_call_operand.vmem [shape: f32[1,32], index: 7, kind: input, shape index: {}]   ;;  %s2629_s8 = inlined_call_operand.hbm [shape: bf16[32,64], index: 8, kind: input, shape index: {}]   ;;  %s2630_s9 = inlined_call_operand.vmem [shape: f32[1,64], index: 9, kind: input, shape index: {}]   ;;  %s2631_s10 = inlined_call_operand.vmem [shape: bf16[64,32], index: 10, kind: input, shape index: {}]   ;;  %s2632_s11 = inlined_call_operand.vmem [shape: f32[1,32], index: 11, kind: input, shape index: {}]   ;;  %s2633_s12 = inlined_call_operand.vmem [shape: f32[1,32], index: 12, kind: input, shape index: {}]   ;;  %s2634_s13 = inlined_call_operand.vmem [shape: f32[1,32], index: 13, kind: input, shape index: {}]   ;;  %s2635_s14 = inlined_call_operand.vmem [shape: f32[1,32], index: 14, kind: input, shape index: {}]   ;;  %s2636_s15 = inlined_call_operand.vmem [shape: f32[1,32], index: 15, kind: input, shape index: {}]   ;;  %s2637_s16 = inlined_call_operand.hbm [shape: f32[2,8,32], index: 16, kind: output, shape index: {}]  }
   0x1   :  { %2646 = sst [smem:[#allocation16_spill]] %s2621_s0 }
   0x2   :  { %2647 = sst [smem:[#allocation17_spill]] %s2622_s1 }
   0x3   :  { %2648 = sst [smem:[#allocation18_spill]] %s2630_s9 }
   0x4   :  { %2649 = sst [smem:[#allocation19_spill]] %s2631_s10 }
   0x5   :  { %2650 = sst [smem:[#allocation20_spill]] %s2632_s11 }
   0x6   :  { %2651 = sst [smem:[#allocation21_spill]] %s2633_s12 }
   0x7   :  { %2652 = sst [smem:[#allocation22_spill]] %s2634_s13 }
   0x8   :  { %2653 = sst [smem:[#allocation23_spill]] %s2635_s14 }
   0x9   :  { %2654 = sst [smem:[#allocation24_spill]] %s2636_s15 }
   0xa   :  { %2655 = sst [smem:[#allocation25_spill]] %s2637_s16 }
   0xb   :  { %21 = vsyncpa [#allocation5], 0 }
   0xc   :  { %23 = vsyncpa [#allocation5 + $0x1], 0 }
   0xd   :  { %24 = vsyncpa [#allocation8], 0 }
   0xe   :  { %25 = vsyncpa [#allocation6], 0 }
   0xf   :  { %27 = vsyncpa [#allocation6 + $0x1], 0  ;;  %s2218_s21 = smov 0   ;;  %s2220_s22 = smov 0  }
  0x10   :  { %s2222_s23 = smov 0   ;;  %s2224_s24 = smov 0  }
  0x11   :  { %s2226_s25 = smov 0   ;;  %s2228_s26 = smov 0  }
  0x12 LB: > { %2656 = sst [smem:[#allocation14_spill]] %s2096_s21  ;;  %s1635_s27 = sadd.s32 4294967295, %s2116_s26   ;;  %s2116_s26 = sphi %s2228_s26, %s33_s26   ;;  %s2112_s25 = sphi %s2226_s25, %s2687_s25   ;;  %s2108_s24 = sphi %s2224_s24, %s2686_s24   ;;  %s2104_s23 = sphi %s2222_s23, %s2685_s23   ;;  %s2100_s22 = sphi %s2220_s22, %s2684_s22   ;;  %s2096_s21 = sphi %s2218_s21, %s2683_s21  }
  0x13   : > { %s1636_s28 = sadd.s32 4294967294, %s2116_s26   ;;  %p93_p0 = scmp.ne.s32.totalorder %s2100_s22, %s2096_s21 }
  0x14   : > { %p2252_p1 = scmp.eq.s32.totalorder %s1635_s27, 0  ;;  %p2256_p2 = scmp.eq.s32.totalorder %s1635_s27, 1 }
  0x15   : > { %p419_p3 = scmp.eq.s32.totalorder %s1636_s28, 1  ;;  %p1637_p5 = scmp.ge.s32.totalorder %s2116_s26, 1 }
  0x16   : > { %s2657_s29 = scalar_select %p2252_p1, 1, 0 }
  0x17   : > { %p2262_p4 = por %p2252_p1, %p93_p0  ;;  %p2267_p6 = por %p419_p3, %p93_p0 }
  0x18   : > { %p426_p7 = scmp.lt.s32.totalorder %s2116_s26, 3  ;;  %s2118_s19 = smov [#allocation7]  }
  0x19   : > { %s2659_s0 = scalar_select %p2262_p4, 1, 0 }
  0x1a   : > { %s2660_s17 = scalar_select %p2267_p6, 1, 0 }
  0x1b   : > { %p2272_p8 = pnand %p1637_p5, %p426_p7  ;;  %s450_s20 = sshll.u32 %s2118_s19, 4  ;;  %s2276_s20 = int_to_ptr.vmem [resolvable:$true] %s450_s20 }
  0x1c   : > { %2661 = sst [smem:[#allocation15_spill]] %s2660_s17  ;;  %s2119_s28 = smov [#allocation9]  }
  0x1d   : > { %p1828_p9 = pneg %p2272_p8  ;;  %s466_s17 = sshll.u32 %s2119_s28, 4  ;;  %s2287_s17 = int_to_ptr.vmem [resolvable:$true] %s466_s17 }
  0x1e   : > { %s1944_s19 = scalar_lea.hbm %s2627_s6, 256 }
  0x1f   : > { %p2283_p11 = pnand %p1828_p9, %p2252_p1  ;;  %p1945_p12 = scmp.ne.s32.totalorder %s2627_s6, %s1944_s19 }
  0x20   : > { %p1951_p5 = scmp.lt.u32.totalorder %s1944_s19, %s2627_s6 }
  0x21   : > { %p1946_p13 = pneg %p2283_p11 }
  0x23   : > { %p1947_p0 = pnand %p1946_p13, %p1945_p12 }
  0x25   : > { %p1948_p3 = pneg %p1947_p0 }
  0x27   : > { %p1953_p7 = pnand %p1951_p5, %p1948_p3 }
  0x29   : > { %1956 = shalt.err (!%p1953_p7)
}
  0x2a   : > { %s1957_s16 = scalar_lea.vmem %s2276_s20, 256  ;;  %p1965_p1 = scmp.lt.s32.totalorder %s2276_s20, %s2276_s20 }
  0x2b   : > { %p1958_p9 = scmp.ne.s32.totalorder %s2276_s20, %s1957_s16  ;;  %p1966_p12 = scmp.lt.s32.totalorder %s1957_s16, %s1957_s16 }
  0x2d   : > { %p1960_p10 = pnand %p1958_p9, %p1946_p13  ;;  %p1967_p0 = por %p1966_p12, %p1965_p1 }
  0x2f   : > { %p1961_p6 = pneg %p1960_p10 }
  0x31   : > { %p1968_p4 = pnand %p1967_p0, %p1961_p6 }
  0x33   : > { %1971 = shalt.err (!%p1968_p4)
}
  0x34   : > { %s2120_s9 = smov 64   ;;  %s2121_s11 = smov 4  }
  0x35   : > { %1831 = dma.hbm_to_vmem [thread:$0]  (!%p2283_p11), %s2627_s6, 256, %s2276_s20, [#allocation8], %s2120_s9, %s2120_s9, %s2121_s11  }
  0x36   : > { %s1972_s19 = scalar_lea.hbm %s2629_s8, 256 }
  0x37   : > { %p1973_p1 = scmp.ne.s32.totalorder %s2629_s8, %s1972_s19  ;;  %p1979_p10 = scmp.lt.u32.totalorder %s1972_s19, %s2629_s8 }
  0x39   : > { %p1975_p4 = pnand %p1973_p1, %p1946_p13 }
  0x3b   : > { %p1976_p6 = pneg %p1975_p4 }
  0x3d   : > { %p1981_p3 = pnand %p1979_p10, %p1976_p6 }
  0x3f   : > { %1984 = shalt.err (!%p1981_p3)
}
  0x40   : > { %s1985_s20 = scalar_lea.vmem %s2287_s17, 256  ;;  %p1993_p12 = scmp.lt.s32.totalorder %s2287_s17, %s2287_s17 }
  0x41   : > { %p1986_p5 = scmp.ne.s32.totalorder %s2287_s17, %s1985_s20  ;;  %p1994_p0 = scmp.lt.s32.totalorder %s1985_s20, %s1985_s20 }
  0x43   : > { %p1988_p7 = pnand %p1986_p5, %p1946_p13  ;;  %p1995_p1 = por %p1994_p0, %p1993_p12 }
  0x45   : > { %p1989_p9 = pneg %p1988_p7 }
  0x47   : > { %p1996_p4 = pnand %p1995_p1, %p1989_p9 }
  0x49   : > { %1999 = shalt.err (!%p1996_p4)
}
  0x4a   : > { %1834 = dma.hbm_to_vmem [thread:$0]  (!%p2283_p11), %s2629_s8, 256, %s2287_s17, [#allocation8], %s2120_s9, %s2120_s9, %s2121_s11  }
  0x4b   : > { %s45_s13 = sadd.s32 1, %s2112_s25  ;;  %s80_s14 = sadd.s32 1, %s2104_s23 }
  0x4c   : > { %p47_p13 = scmp.ge.s32.totalorder %s45_s13, 2  ;;  %p87_p6 = scmp.ne.s32.totalorder %s2104_s23, %s2100_s22 }
  0x4d   : > { %p88_p10 = scmp.eq.s32.totalorder %s2116_s26, 0  ;;  %p1845_p3 = scmp.lt.s32.totalorder %s2116_s26, 2 }
  0x4e   : > { %s2689_s13 = smov (%p47_p13, %s45_s13), 0  ;;  %p2351_p7 = por %p2256_p2, %p87_p6 }
  0x4f   : > { %p89_p5 = por %p88_p10, %p87_p6  ;;  %s77_s15 = ssub.s32 %s2112_s25, %s2689_s13 }
  0x50   : > { %s2664_s27 = scalar_select %p2351_p7, 1, 0 }
  0x51   : > { %s511_s21 = sand.u32 1, %s2104_s23   ;;  %p78_p9 = scmp.eq.s32.totalorder %s77_s15, 0 }
  0x52   : > { %s1641_s17 = sshll.u32 %s511_s21, 2  ;;  %s1642_s9 = sshll.u32 %s2112_s25, 6 }
  0x53   : > { %s2360_s11 = scalar_select %p78_p9, %s2104_s23, %s80_s14  }
  0x54   : > { %s2665_s1 = sld [smem:[#allocation17_spill]]  ;;  %s515_s30 = scalar_lea.vmem [#allocation4], %s1641_s17 }
  0x55   : > { %s522_s20 = sshll.u32 %s515_s30, 4  ;;  %p2369_p2 = pnand %p1845_p3, %p89_p5  ;;  %s2373_s20 = int_to_ptr.vmem [resolvable:$true] %s522_s20 }
  0x56   : > { %s512_s12 = scalar_lea.sflag [#allocation5], %s511_s21 }
  0x57   : > { %p2002_p12 = pneg %p2369_p2 }
  0x5a   : > { %s2365_s16 = scalar_lea.hbm %s2665_s1, %s1642_s9  ;;  %s2005_s9 = scalar_lea.hbm %s2665_s1, 128 }
  0x5b   : > { %s2000_s14 = scalar_lea.hbm %s2365_s16, 64  ;;  %p2006_p4 = scmp.lt.u32.totalorder %s2365_s16, %s2665_s1 }
  0x5c   : > { %p2001_p11 = scmp.ne.s32.totalorder %s2365_s16, %s2000_s14  ;;  %p2007_p13 = scmp.lt.u32.totalorder %s2005_s9, %s2000_s14 }
  0x5d   : > { %p2009_p10 = scmp.lt.u32.totalorder %s2000_s14, %s2365_s16 }
  0x5e   : > { %p2003_p0 = pnand %p2002_p12, %p2001_p11  ;;  %p2008_p6 = por %p2007_p13, %p2006_p4 }
  0x60   : > { %p2004_p1 = pneg %p2003_p0  ;;  %p2010_p3 = por %p2009_p10, %p2008_p6 }
  0x62   : > { %p2011_p5 = pnand %p2010_p3, %p2004_p1 }
  0x64   : > { %2014 = shalt.err (!%p2011_p5)
}
  0x65   : > { %s2015_s21 = scalar_lea.vmem %s2373_s20, 64  ;;  %s2122_s30 = smov [#allocation4]  }
  0x66   : > { %p2016_p9 = scmp.ne.s32.totalorder %s2373_s20, %s2015_s21  ;;  %s2020_s15 = sshll.u32 %s2122_s30, 4  ;;  %s2021_s15 = int_to_ptr.vmem [resolvable:$false] %s2020_s15 }
  0x67   : > { %s2022_s17 = scalar_lea.vmem %s2021_s15, 128  ;;  %p2023_p7 = scmp.lt.s32.totalorder %s2373_s20, %s2021_s15 }
  0x68   : > { %p2018_p11 = pnand %p2016_p9, %p2002_p12  ;;  %p2024_p4 = scmp.lt.s32.totalorder %s2022_s17, %s2015_s21 }
  0x6a   : > { %p2019_p0 = pneg %p2018_p11  ;;  %p2025_p13 = por %p2024_p4, %p2023_p7 }
  0x6c   : > { %p2026_p6 = pnand %p2025_p13, %p2019_p0 }
  0x6e   : > { %2029 = shalt.err (!%p2026_p6)
}
  0x6f   : > { %1838 = dma.hbm_to_vmem [thread:$0]  (!%p2369_p2), %s2365_s16, 64, %s2373_s20, %s512_s12  }
  0x70   : > { %531 = sbr.rel (%p2272_p8) target bundleno = 2494 (0x9be), region = 84  ;;  %s2403_s14 = sand.u32 (!%p2272_p8), 1, %s2100_s22  }
  0x71   : > { %s1644_s9 = sshll.u32 (!%p2272_p8), %s2403_s14, 2  ;;  %s534_s28 = scalar_lea.sflag (!%p2272_p8), [#allocation5], %s2403_s14 }
  0x72   : > { %s537_s19 = scalar_lea.vmem (!%p2272_p8), [#allocation4], %s1644_s9  ;;  %p2667_p7 = scmp.ne.s32.totalorder (!%p2272_p8), %s2659_s0, 0 }
  0x77   : > { %2083 = dma.done.wait (%p2667_p7), %s534_s28, 64  }
  0x78   : > { %2085 = vsyncadd (%p2667_p7), %s534_s28, 4294967232  ;;  %p2668_p12 = scmp.ne.s32.totalorder %s2657_s29, 0 }
  0x7a   : > { %2087 = dma.done.wait (%p2668_p12), [#allocation8], 512  }
  0x7b   : > { %2089 = vsyncadd (%p2668_p12), [#allocation8], 4294966784  ;;  %v2123_v0 = vmov 0.0   ;;  %vm2124_vm0 = vmmov 0   ;;  %p601_p8 = scmp.lt.s32.totalorder %s2108_s24, 1  ;;  %v1910_v1 = vld [vmem:[%s2625_s4] sm:$0xff]  }
  0x7c   : > { %1724 = vmatprep.subr.bf16.mxu1 %v2123_v0  ;;  %1728 = vmatprep.mubr.msk.bf16.mxu1 %vm2124_vm0, %v2123_v0  ;;  %v1911_v2 = vld [vmem:[%s2625_s4 + $0x8] sm:$0xff]   ;;  %vm637_vm1 = vcmask 261120   ;;  %v1912_v4 = vld [vmem:[%s2623_s2] sm:$0xff]   ;;  %s2669_s17 = sld [smem:[#allocation16_spill]]  ;;  %vm682_vm2 = vcmask 257024   ;;  %vm763_vm3 = vcmask 64512  }
  0x7d   : > { %1740 = vmatprep.subr.bf16.mxu0 %v2123_v0  ;;  %1742 = vmatprep.mubr.msk.bf16.mxu0 %vm2124_vm0, %v2123_v0  ;;  %s602_s29 = scalar_select %p601_p8, %s2108_s24, 1  ;;  %v613_v3 = vld [vmem:[%s537_s19] sm:$0xf]  ;;  %v1649_v8 = vld [vmem:[%s2626_s5] ss:$0 sm:$0xff]  ;;  %vm823_vm4 = vcmask 1043456  }
  0x7e   : > { %1725 = vmatpush3.bf16.msra.mxu1 %v1910_v1  ;;  %v1913_v5 = vld [vmem:[%s2623_s2 + $0x8] sm:$0xff]   ;;  %v1654_v15 = vld [vmem:[%s2624_s3] ss:$0 sm:$0xff]  ;;  %s2125_s20 = smov 112   ;;  %s2126_s10 = smov 120   ;;  %vm1222_vm5 = vcmask 130048  }
  0x7f   : > { %1726 = vmatprep.subr.bf16.mxu1 %v2123_v0  ;;  %s1648_s21 = sshll.u32 %s602_s29, 3  ;;  %s2127_s12 = smov 104   ;;  %vm1225_vm6 = vcmask 195584   ;;  %vm1432_vm7 = vcmask 523264  }
  0x80   : > { %s2129_s30 = smov 8   ;;  %s2130_s15 = smov 16  }
  0x81   : > { %s2670_s18 = sld [smem:[#allocation19_spill]]  ;;  %s2673_s16 = sld [smem:[#allocation18_spill]] }
  0x82   : > { %1727 = vmatpush3.bf16.msra.mxu1 %v1911_v2  ;;  %s607_s9 = scalar_lea.vmem %s2669_s17, %s1648_s21  ;;  %s2128_s21 = smov 96  }
  0x83   : > { %1732 = vmatprep.subr.bf16.mxu1 %v2123_v0  ;;  %v2443_v6 = vld [vmem:[%s607_s9] sm:$0xff]  ;;  %s2131_s17 = smov 24   ;;  %s2676_s0 = sld [smem:[#allocation24_spill]] }
  0x84   : > { %v692_v7 = vpack.c.bf16 %v2443_v6, %v2443_v6  ;;  %s1687_s19 = sshll.u32 %s2108_s24, 7  ;;  %p2678_p1 = scmp.ne.s32.totalorder %s2664_s27, 0 }
  0x85   : > { %1729 = vmatmul.mubr.msk.bf16.vlgmr.msra.gmra.mrb[0].mxu1 %vm637_vm1, %v613_v3  ;;  %s2132_s24 = smov [#allocation10]  }
  0x86   : > { %1733 = vmatpush3.bf16.msra.mxu1 %v1912_v4  ;;  %1736 = vmatprep.mubr.msk.bf16.mxu1 %vm2124_vm0, %v2123_v0 }
  0x87   : > { %1734 = vmatprep.subr.bf16.mxu1 %v2123_v0 }
  0x8a   : > { %1735 = vmatpush3.bf16.msra.mxu1 %v1913_v5 }
  0x8b   : > { %1746 = vmatprep.subr.bf16.mxu1 %v2123_v0 }
  0x8d   : > { %1737 = vmatmul.mubr.msk.bf16.vlgmr.msra.gmra.mrb[4].mxu1 %vm637_vm1, %v692_v7 }
  0x8e   : > { %1748 = vmatprep.mubr.msk.bf16.mxu1 %vm2124_vm0, %v2123_v0 }
 0x158   : > { %v675_v9 = vpop.f32.mrb[0].mxu1 }
 0x159   : > { %v676_v10 = vadd.f32 %v1649_v8, %v675_v9  ;;  %v1730_v11 = vpop.f32.mrb[1].mxu1 }
 0x15a   : > { %v678_v12 = vpop.f32.mrb[2].mxu1 }
 0x15b   : > { %v681_v13 = vpack.c.bf16 %v676_v10, %v676_v10  ;;  %v1731_v14 = vpop.f32.mrb[3].mxu1 }
 0x15d   : > { %683 = vst.msk [vmem:[#allocation2] sm:$0xf] %vm682_vm2, %v681_v13 }
 0x160   : > { %v754_v16 = vpop.f32.mrb[4].mxu1 }
 0x161   : > { %v1738_v17 = vpop.f32.mrb[5].mxu1  ;;  %v755_v19 = vadd.f32 %v1654_v15, %v754_v16 }
 0x162   : > { %v757_v18 = vpop.f32.mrb[6].mxu1 }
 0x163   : > { %v1739_v20 = vpop.f32.mrb[7].mxu1  ;;  %v760_v24 = vpack.c.bf16 %v755_v19, %v755_v19 }
 0x164   : > { %v761_v21 = vld [vmem:[#allocation2] sm:$0xf] }
 0x165   : > { %v768_v22 = vsel %vm763_vm3, %v761_v21, 0  ;;  %v1660_v23 = vcombine.low %v761_v21, %v761_v21 }
 0x166   : > { %1741 = vmatpush3.bf16.xpose.msra.mxu0 %v768_v22 }
 0x167   : > { %990 = vrot.lane.b32.xlu1 %v1660_v23, %s2125_s20  ;;  %876 = vrot.lane.b32.xlu0 %v1660_v23, %s2126_s10 }
 0x168   : > { %1752 = vmatprep.subr.bf16.mxu0 %v2123_v0 }
 0x16b   : > { %988 = vrot.lane.b32.xlu1 %v760_v24, %s2125_s20  ;;  %871 = vrot.lane.b32.xlu0 %v760_v24, %s2126_s10 }
 0x16d   : > { %1743 = vmatmul.mubr.msk.bf16.vlgmr.msra.gmra.mrb[0].mxu0 %vm763_vm3, %v760_v24 }
 0x16e   : > { %1754 = vmatprep.mubr.msk.bf16.mxu0 %vm2124_vm0, %v2123_v0 }
 0x16f   : > { %1099 = vrot.lane.b32.xlu1 %v760_v24, %s2127_s12  ;;  %1101 = vrot.lane.b32.xlu0 %v1660_v23, %s2127_s12 }
 0x173   : > { %687 = vrot.lane.b32.xlu0 %v681_v13, %s2128_s21  ;;  %s1647_s21 = sshll.u32 %s2403_s14, 3 }
 0x174   : > { %s600_s29 = scalar_lea.vmem [#allocation10], %s1647_s21  ;;  %s2034_s21 = sshll.u32 %s2132_s24, 4  ;;  %s2035_s21 = int_to_ptr.vmem [resolvable:$false] %s2034_s21 }
 0x1d9   : > { %v877_v25 = vpop.permute.xlu0 %876  ;;  %v991_v28 = vpop.permute.xlu1 %990 }
 0x1da   : > { %v882_v26 = vsel %vm763_vm3, %v877_v25, 0  ;;  %v996_v30 = vsel %vm763_vm3, %v991_v28, 0 }
 0x1db   : > { %1753 = vmatpush3.bf16.xpose.msra.mxu0 %v882_v26 }
 0x1dc   : > { %1764 = vmatprep.subr.bf16.mxu0 %v2123_v0 }
 0x1dd   : > { %v872_v27 = vpop.permute.xlu0 %871  ;;  %v989_v32 = vpop.permute.xlu1 %988 }
 0x1e1   : > { %v1102_v29 = vpop.permute.xlu0 %1101  ;;  %v1100_v36 = vpop.permute.xlu1 %1099 }
 0x1e2   : > { %1755 = vmatmul.mubr.msk.bf16.vlgmr.msra.gmra.mrb[4].mxu0 %vm763_vm3, %v872_v27  ;;  %v1107_v33 = vsel %vm763_vm3, %v1102_v29, 0 }
 0x1e3   : > { %1765 = vmatpush3.bf16.xpose.msra.mxu0 %v996_v30  ;;  %1766 = vmatprep.mubr.msk.bf16.mxu0 %vm2124_vm0, %v2123_v0 }
 0x1e4   : > { %1776 = vmatprep.subr.bf16.mxu0 %v2123_v0 }
 0x1e5   : > { %v688_v31 = vpop.permute.xlu0 %687 }
 0x1e6   : > { %690 = vst.msk [vmem:[#allocation3] sm:$0xf] %vm682_vm2, %v688_v31 }
 0x1ea   : > { %1767 = vmatmul.mubr.msk.bf16.vlgmr.msra.gmra.mrb[8].mxu0 %vm763_vm3, %v989_v32 }
 0x1eb   : > { %1777 = vmatpush3.bf16.xpose.msra.mxu0 %v1107_v33  ;;  %1778 = vmatprep.mubr.msk.bf16.mxu0 %vm2124_vm0, %v2123_v0 }
 0x1ec   : > { %1788 = vmatprep.subr.bf16.mxu0 %v2123_v0 }
 0x1ed   : > { %v762_v34 = vld [vmem:[#allocation3] sm:$0xf] }
 0x1ee   : > { %v825_v35 = vsel %vm823_vm4, %v762_v34, 0  ;;  %v1662_v42 = vcombine.low %v762_v34, %v762_v34  ;;  %v1916_v34 = vld [vmem:[#allocation7] sm:$0xff]  }
 0x1ef   : > { %1747 = vmatpush3.bf16.msra.mxu1 %v825_v35 }
 0x1f0   : > { %1758 = vmatprep.subr.bf16.mxu1 %v2123_v0 }
 0x1f2   : > { %1779 = vmatmul.mubr.msk.bf16.vlgmr.msra.gmra.mrb[12].mxu0 %vm763_vm3, %v1100_v36 }
 0x1f3   : > { %1792 = vmatprep.mubr.msk.bf16.mxu0 %vm2124_vm0, %v2123_v0  ;;  %1789 = vmatpush3.bf16.msra.mxu0 %v1916_v34 }
 0x1f4   : > { %1790 = vmatprep.subr.bf16.mxu0 %v2123_v0 }
 0x240   : > { %v804_v37 = vpop.f32.mrb[0].mxu0 }
 0x241   : > { %v1744_v38 = vpop.f32.mrb[1].mxu0  ;;  %v810_v39 = vsel %vm763_vm3, %v804_v37, -inf }
 0x242   : > { %811 = vmax.xlane.f32.xlu1 %v810_v39  ;;  %v807_v40 = vpop.f32.mrb[2].mxu0  ;;  %v1917_v38 = vld [vmem:[#allocation7 + $0x8] sm:$0xff]  }
 0x243   : > { %v1745_v41 = vpop.f32.mrb[3].mxu0  ;;  %1791 = vmatpush3.bf16.msra.mxu0 %v1917_v38 }
 0x244   : > { %1804 = vmatprep.subr.bf16.mxu0 %v2123_v0 }
 0x253   : > { %1048 = vrot.lane.b32.xlu1 %v1662_v42, %s2125_s20 }
 0x2b5   : > { %v918_v43 = vpop.f32.mrb[4].mxu0 }
 0x2b6   : > { %v1756_v44 = vpop.f32.mrb[5].mxu0  ;;  %v924_v45 = vsel %vm763_vm3, %v918_v43, -inf }
 0x2b7   : > { %925 = vmax.xlane.f32.xlu0 %v924_v45  ;;  %v921_v46 = vpop.f32.mrb[6].mxu0 }
 0x2b8   : > { %v1757_v47 = vpop.f32.mrb[7].mxu0 }
 0x2bd   : > { %v1032_v48 = vpop.f32.mrb[8].mxu0 }
 0x2be   : > { %v1768_v49 = vpop.f32.mrb[9].mxu0  ;;  %v1038_v50 = vsel %vm763_vm3, %v1032_v48, -inf }
 0x2bf   : > { %1039 = vmax.xlane.f32.xlu0 %v1038_v50  ;;  %v1035_v51 = vpop.f32.mrb[10].mxu0 }
 0x2c0   : > { %v1769_v52 = vpop.f32.mrb[11].mxu0 }
 0x2c5   : > { %v1143_v53 = vpop.f32.mrb[12].mxu0 }
 0x2c6   : > { %v1780_v54 = vpop.f32.mrb[13].mxu0  ;;  %v1149_v55 = vsel %vm763_vm3, %v1143_v53, -inf }
 0x2c7   : > { %1150 = vmax.xlane.f32.xlu1 %v1149_v55  ;;  %v1146_v56 = vpop.f32.mrb[14].mxu0 }
 0x2c8   : > { %v1781_v57 = vpop.f32.mrb[15].mxu0 }
 0x2cf   : > { %v812_v58 = vpop.xlane.xlu1 %811 }
 0x2d0   : > { %v813_v59 = vsub.f32 %v804_v37, %v812_v58 }
 0x2d2   : > { %v814_v60 = vmul.f32 1.442695, %v813_v59 }
 0x2d3   : > { %v1049_v7 = vpop.permute.xlu1 %1048 }
 0x2d4   : > { %1924 = vpow2.f32 %v814_v60  ;;  %v1054_v15 = vsel %vm823_vm4, %v1049_v7, 0 }
 0x2d5   : > { %937 = vrot.lane.b32.xlu0 %v1662_v42, %s2126_s10 }
 0x2d8   : > { %1159 = vrot.lane.b32.xlu1 %v1662_v42, %s2127_s12  ;;  %s2671_s12 = sld [smem:[#allocation21_spill]] }
 0x2de   : > { %v1925_v61 = vpop.eup %1924 }
 0x2df   : > { %v819_v62 = vpack.c.bf16 %v1925_v61, %v1925_v61  ;;  %v816_v25 = vsel %vm763_vm3, %v1925_v61, 0.0 }
 0x2e1   : > { %1749 = vmatmul.mubr.msk.bf16.vlgmr.msra.gmra.mrb[8].mxu1 %vm763_vm3, %v819_v62 }
 0x2e2   : > { %1760 = vmatprep.mubr.msk.bf16.mxu1 %vm2124_vm0, %v2123_v0 }
 0x344   : > { %v926_v63 = vpop.xlane.xlu0 %925 }
 0x345   : > { %v927_v1 = vsub.f32 %v918_v43, %v926_v63 }
 0x347   : > { %v928_v2 = vmul.f32 1.442695, %v927_v1 }
 0x349   : > { %1926 = vpow2.f32 %v928_v2 }
 0x34c   : > { %v1040_v3 = vpop.xlane.xlu0 %1039 }
 0x34d   : > { %v1041_v4 = vsub.f32 %v1032_v48, %v1040_v3  ;;  %v1668_v3 = vld [vmem:[%s2628_s7] ss:$0 sm:$0xff] }
 0x34f   : > { %v1042_v5 = vmul.f32 1.442695, %v1041_v4 }
 0x350   : > { %v938_v8 = vpop.permute.xlu0 %937 }
 0x351   : > { %1928 = vpow2.f32 %v1042_v5  ;;  %v943_v9 = vsel %vm823_vm4, %v938_v8, 0 }
 0x352   : > { %1759 = vmatpush3.bf16.msra.mxu1 %v943_v9 }
 0x353   : > { %v1927_v10 = vpop.eup %1926  ;;  %1770 = vmatprep.subr.bf16.mxu1 %v2123_v0 }
 0x354   : > { %v1151_v11 = vpop.xlane.xlu1 %1150  ;;  %v930_v12 = vsel %vm763_vm3, %v1927_v10, 0.0  ;;  %v933_v13 = vpack.c.bf16 %v1927_v10, %v1927_v10 }
 0x355   : > { %v1152_v14 = vsub.f32 %v1143_v53, %v1151_v11  ;;  %931 = vadd.xlane.f32.xlu0 %v930_v12 }
 0x356   : > { %1761 = vmatmul.mubr.msk.bf16.vlgmr.msra.gmra.mrb[12].mxu1 %vm763_vm3, %v933_v13 }
 0x357   : > { %v1153_v16 = vmul.f32 1.442695, %v1152_v14  ;;  %1771 = vmatpush3.bf16.msra.mxu1 %v1054_v15  ;;  %1772 = vmatprep.mubr.msk.bf16.mxu1 %vm2124_vm0, %v2123_v0 }
 0x358   : > { %1782 = vmatprep.subr.bf16.mxu1 %v2123_v0  ;;  %v1160_v18 = vpop.permute.xlu1 %1159 }
 0x359   : > { %1930 = vpow2.f32 %v1153_v16  ;;  %v1165_v21 = vsel %vm823_vm4, %v1160_v18, 0  ;;  %v1919_v18 = vld [vmem:[#allocation9 + $0x8] sm:$0xff]  }
 0x35b   : > { %v1929_v17 = vpop.eup %1928 }
 0x35c   : > { %v1044_v19 = vsel %vm763_vm3, %v1929_v17, 0.0  ;;  %v1047_v20 = vpack.c.bf16 %v1929_v17, %v1929_v17  ;;  %v1918_v17 = vld [vmem:[#allocation9] sm:$0xff]  }
 0x35d   : > { %1045 = vadd.xlane.f32.xlu1 %v1044_v19  ;;  %v1921_v19 = vld [vmem:[%s2670_s18 + $0x8] sm:$0xff]  }
 0x35e   : > { %1773 = vmatmul.mubr.msk.bf16.vlgmr.msra.gmra.mrb[16].mxu1 %vm763_vm3, %v1047_v20 }
 0x35f   : > { %1783 = vmatpush3.bf16.msra.mxu1 %v1165_v21  ;;  %1784 = vmatprep.mubr.msk.bf16.mxu1 %vm2124_vm0, %v2123_v0 }
 0x360   : > { %1796 = vmatprep.subr.bf16.mxu1 %v2123_v0 }
 0x363   : > { %v1931_v22 = vpop.eup %1930 }
 0x364   : > { %v1155_v23 = vsel %vm763_vm3, %v1931_v22, 0.0  ;;  %v1158_v24 = vpack.c.bf16 %v1931_v22, %v1931_v22 }
 0x365   : > { %1156 = vadd.xlane.f32.xlu0 %v1155_v23 }
 0x366   : > { %1785 = vmatmul.mubr.msk.bf16.vlgmr.msra.gmra.mrb[20].mxu1 %vm763_vm3, %v1158_v24  ;;  %v1672_v24 = vld [vmem:[%s2671_s12] ss:$0 sm:$0xff]  ;;  %s2674_s12 = sld [smem:[#allocation20_spill]] }
 0x367   : > { %1800 = vmatprep.mubr.msk.bf16.mxu1 %vm2124_vm0, %v2123_v0  ;;  %1797 = vmatpush3.bf16.msra.mxu1 %v1918_v17 }
 0x368   : > { %1798 = vmatprep.subr.bf16.mxu1 %v2123_v0 }
 0x369   : > { %817 = vadd.xlane.f32.xlu0 %v816_v25 }
 0x36b   : > { %1799 = vmatpush3.bf16.msra.mxu1 %v1919_v18 }
 0x3b4   : > { %v861_v26 = vpop.f32.mrb[8].mxu1 }
 0x3b5   : > { %v1750_v27 = vpop.f32.mrb[9].mxu1 }
 0x3b6   : > { %v864_v28 = vpop.f32.mrb[10].mxu1 }
 0x3b7   : > { %v1751_v29 = vpop.f32.mrb[11].mxu1 }
 0x3e2   : > { %v932_v30 = vpop.xlane.xlu0 %931 }
 0x3e3   : > { %1932 = vrcp.f32 %v932_v30  ;;  %v1922_v30 = vld [vmem:[%s2670_s18 + $0x10] sm:$0xff]  }
 0x3ea   : > { %v1046_v31 = vpop.xlane.xlu1 %1045 }
 0x3eb   : > { %1934 = vrcp.f32 %v1046_v31  ;;  %v1923_v31 = vld [vmem:[%s2670_s18 + $0x18] sm:$0xff]  }
 0x3ed   : > { %v1933_v32 = vpop.eup %1932 }
 0x3f2   : > { %v1157_v39 = vpop.xlane.xlu0 %1156 }
 0x3f3   : > { %1936 = vrcp.f32 %v1157_v39 }
 0x3f5   : > { %v1935_v42 = vpop.eup %1934 }
 0x3f6   : > { %v818_v56 = vpop.xlane.xlu0 %817 }
 0x3f7   : > { %1938 = vrcp.f32 %v818_v56 }
 0x3fd   : > { %v1937_v49 = vpop.eup %1936 }
 0x401   : > { %v1939_v57 = vpop.eup %1938 }
 0x402   : > { %v868_v58 = vmul.f32 %v1939_v57, %v861_v26 }
 0x404   : > { %v869_v60 = vpack.c.bf16 %v868_v58, %v868_v58  ;;  %v1685_v58 = vld [vmem:[%s2676_s0] ss:$0 sm:$0xff] }
 0x429   : > { %v979_v33 = vpop.f32.mrb[12].mxu1 }
 0x42a   : > { %v986_v35 = vmul.f32 %v1933_v32, %v979_v33  ;;  %v1762_v36 = vpop.f32.mrb[13].mxu1  ;;  %v1674_v32 = vld [vmem:[%s2673_s16] ss:$0 sm:$0xff]  ;;  %s1522_s16 = sshll.u32 %s600_s29, 4  ;;  %s2573_s16 = int_to_ptr.vmem [resolvable:$true] %s1522_s16 }
 0x42b   : > { %v982_v37 = vpop.f32.mrb[14].mxu1  ;;  %p2037_p5 = scmp.lt.s32.totalorder %s2573_s16, %s2035_s21 }
 0x42c   : > { %v987_v40 = vpack.c.bf16 %v986_v35, %v986_v35  ;;  %v1763_v41 = vpop.f32.mrb[15].mxu1 }
 0x42e   : > { %1211 = vrot.lane.b32.xlu1 %v987_v40, %s2129_s30  ;;  %s1508_s30 = scalar_lea.sflag [#allocation6], %s2403_s14 }
 0x431   : > { %v1090_v43 = vpop.f32.mrb[16].mxu1 }
 0x432   : > { %v1097_v44 = vmul.f32 %v1935_v42, %v1090_v43  ;;  %v1774_v45 = vpop.f32.mrb[17].mxu1 }
 0x433   : > { %v1093_v46 = vpop.f32.mrb[18].mxu1 }
 0x434   : > { %v1098_v47 = vpack.c.bf16 %v1097_v44, %v1097_v44  ;;  %v1775_v48 = vpop.f32.mrb[19].mxu1 }
 0x436   : > { %1214 = vrot.lane.b32.xlu0 %v1098_v47, %s2130_s15  ;;  %s2672_s15 = sld [smem:[#allocation22_spill]] }
 0x439   : > { %v1201_v50 = vpop.f32.mrb[20].mxu1 }
 0x43a   : > { %v1208_v51 = vmul.f32 %v1937_v49, %v1201_v50  ;;  %v1786_v52 = vpop.f32.mrb[21].mxu1 }
 0x43b   : > { %v1204_v53 = vpop.f32.mrb[22].mxu1 }
 0x43c   : > { %v1209_v54 = vpack.c.bf16 %v1208_v51, %v1208_v51  ;;  %v1787_v55 = vpop.f32.mrb[23].mxu1  ;;  %v1673_v26 = vld [vmem:[%s2672_s15] ss:$0 sm:$0xff]  ;;  %s2030_s15 = scalar_lea.vmem %s2573_s16, 128 }
 0x43d   : > { %p2031_p2 = scmp.ne.s32.totalorder %s2573_s16, %s2030_s15 }
 0x43e   : > { %1217 = vrot.lane.b32.xlu1 %v1209_v54, %s2131_s17  ;;  %s2675_s17 = sld [smem:[#allocation23_spill]] }
 0x43f   : > { %p2032_p10 = pnand %p2031_p2, %p2678_p1 }
 0x441   : > { %p2033_p3 = pneg %p2032_p10 }
 0x444   : > { %v1684_v56 = vld [vmem:[%s2675_s17] ss:$0 sm:$0xff]  ;;  %s2036_s17 = scalar_lea.vmem %s2035_s21, 256 }
 0x445   : > { %p2038_p9 = scmp.lt.s32.totalorder %s2036_s17, %s2030_s15 }
 0x447   : > { %p2039_p11 = por %p2038_p9, %p2037_p5 }
 0x449   : > { %p2040_p0 = pnand %p2039_p11, %p2033_p3 }
 0x4a0   : > { %v1212_v59 = vpop.permute.xlu1 %1211 }
 0x4a1   : > { %v1221_v62 = vsel %vm763_vm3, %v869_v60, %v1212_v59 }
 0x4a8   : > { %v1215_v61 = vpop.permute.xlu0 %1214 }
 0x4a9   : > { %v1224_v63 = vsel %vm1222_vm5, %v1221_v62, %v1215_v61 }
 0x4b0   : > { %v1218_v1 = vpop.permute.xlu1 %1217 }
 0x4b1   : > { %v1227_v2 = vsel %vm1225_vm6, %v1224_v63, %v1218_v1 }
 0x4b2   : > { %1793 = vmatmul.mubr.msk.bf16.vlgmr.msra.gmra.mrb[16].mxu0 %vm637_vm1, %v1227_v2 }
 0x4b3   : > { %1812 = vmatprep.mubr.msk.bf16.mxu0 %vm2124_vm0, %v2123_v0 }
 0x585   : > { %v1287_v4 = vpop.f32.mrb[16].mxu0 }
 0x586   : > { %v1288_v5 = vadd.f32 %v1668_v3, %v1287_v4  ;;  %v1794_v7 = vpop.f32.mrb[17].mxu0 }
 0x587   : > { %v1290_v8 = vpop.f32.mrb[18].mxu0 }
 0x588   : > { %v1795_v9 = vpop.f32.mrb[19].mxu0  ;;  %v1293_v10 = vadd.f32 %v1288_v5, %v2443_v6  ;;  %v1920_v6 = vld [vmem:[%s2670_s18] sm:$0xff]  }
 0x589   : > { %1805 = vmatpush3.bf16.msra.mxu0 %v1920_v6 }
 0x58a   : > { %v1296_v11 = vsel %vm637_vm1, %v1293_v10, 0.0  ;;  %1806 = vmatprep.subr.bf16.mxu0 %v2123_v0 }
 0x58b   : > { %1297 = vadd.xlane.f32.xlu1 %v1296_v11 }
 0x58d   : > { %1807 = vmatpush3.bf16.msra.mxu0 %v1921_v19 }
 0x58e   : > { %1808 = vmatprep.subr.bf16.mxu0 %v2123_v0 }
 0x591   : > { %1809 = vmatpush3.bf16.msra.mxu0 %v1922_v30 }
 0x592   : > { %1810 = vmatprep.subr.bf16.mxu0 %v2123_v0  ;;  %v1678_v0 = vld [vmem:[%s2674_s12] ss:$0 sm:$0xff]  ;;  %s2677_s12 = sld [smem:[#allocation25_spill]] }
 0x595   : > { %1811 = vmatpush3.bf16.msra.mxu0 %v1923_v31 }
 0x598   : > { %s2571_s1 = scalar_lea.hbm %s2677_s12, %s1687_s19 }
 0x618   : > { %v1298_v12 = vpop.xlane.xlu1 %1297 }
 0x619   : > { %v1300_v13 = vmul.f32 0.03125, %v1298_v12 }
 0x61b   : > { %v1301_v14 = vsub.f32 %v1293_v10, %v1300_v13 }
 0x61d   : > { %v1302_v15 = vmul.f32 %v1301_v14, %v1301_v14 }
 0x61f   : > { %v1303_v16 = vsel %vm637_vm1, %v1302_v15, 0.0 }
 0x620   : > { %1304 = vadd.xlane.f32.xlu0 %v1303_v16 }
 0x6ad   : > { %v1305_v20 = vpop.xlane.xlu0 %1304 }
 0x6ae   : > { %v1306_v21 = vmul.f32 0.03125, %v1305_v20 }
 0x6b0   : > { %v1307_v22 = vadd.f32 1e-05, %v1306_v21 }
 0x6b2   : > { %1940 = vrsqrt.f32 %v1307_v22 }
 0x6bc   : > { %v1941_v23 = vpop.eup %1940 }
 0x6bd   : > { %v1309_v25 = vmul.f32 %v1941_v23, %v1301_v14 }
 0x6bf   : > { %v1316_v27 = vmul.f32 %v1672_v24, %v1309_v25 }
 0x6c1   : > { %v1323_v28 = vadd.f32 %v1673_v26, %v1316_v27 }
 0x6c3   : > { %v1324_v29 = vpack.c.bf16 %v1323_v28, %v1323_v28 }
 0x6c5   : > { %1801 = vmatmul.mubr.msk.bf16.vlgmr.msra.gmra.mrb[24].mxu1 %vm637_vm1, %v1324_v29 }
 0x798   : > { %v1385_v33 = vpop.f32.mrb[24].mxu1 }
 0x799   : > { %v1386_v34 = vadd.f32 %v1674_v32, %v1385_v33  ;;  %v1802_v35 = vpop.f32.mrb[25].mxu1 }
 0x79a   : > { %v1388_v36 = vpop.f32.mrb[26].mxu1 }
 0x79b   : > { %v1391_v37 = vmax.f32 %v1386_v34, 0.0  ;;  %v1803_v38 = vpop.f32.mrb[27].mxu1 }
 0x79d   : > { %v1392_v39 = vpack.c.bf16 %v1391_v37, %v1391_v37 }
 0x79f   : > { %1813 = vmatmul.mubr.msk.bf16.vlgmr.msra.gmra.mrb[20].mxu0 %vm1432_vm7, %v1392_v39 }
 0x872   : > { %v1470_v40 = vpop.f32.mrb[20].mxu0 }
 0x873   : > { %v1471_v41 = vadd.f32 %v1678_v0, %v1470_v40  ;;  %v1814_v42 = vpop.f32.mrb[21].mxu0 }
 0x874   : > { %v1473_v43 = vpop.f32.mrb[22].mxu0 }
 0x875   : > { %v1815_v44 = vpop.f32.mrb[23].mxu0  ;;  %v1476_v45 = vadd.f32 %v1471_v41, %v1323_v28 }
 0x877   : > { %v1479_v46 = vsel %vm637_vm1, %v1476_v45, 0.0 }
 0x878   : > { %1480 = vadd.xlane.f32.xlu0 %v1479_v46 }
 0x905   : > { %v1481_v47 = vpop.xlane.xlu0 %1480 }
 0x906   : > { %v1482_v48 = vmul.f32 0.03125, %v1481_v47 }
 0x908   : > { %v1483_v49 = vsub.f32 %v1476_v45, %v1482_v48 }
 0x90a   : > { %v1484_v50 = vmul.f32 %v1483_v49, %v1483_v49 }
 0x90c   : > { %v1485_v51 = vsel %vm637_vm1, %v1484_v50, 0.0 }
 0x90d   : > { %1486 = vadd.xlane.f32.xlu1 %v1485_v51 }
 0x99a   : > { %v1487_v52 = vpop.xlane.xlu1 %1486 }
 0x99b   : > { %v1488_v53 = vmul.f32 0.03125, %v1487_v52 }
 0x99d   : > { %v1489_v54 = vadd.f32 1e-05, %v1488_v53 }
 0x99f   : > { %1942 = vrsqrt.f32 %v1489_v54 }
 0x9a9   : > { %v1943_v55 = vpop.eup %1942 }
 0x9aa   : > { %v1491_v57 = vmul.f32 %v1943_v55, %v1483_v49 }
 0x9ac   : > { %v1498_v59 = vmul.f32 %v1684_v56, %v1491_v57 }
 0x9ae   : > { %v1505_v60 = vadd.f32 %v1685_v58, %v1498_v59 }
 0x9b0   : > { %1506 = vst.msk [vmem:[%s600_s29] sm:$0xff] %vm637_vm1, %v1505_v60 }
 0x9b1   : > { %2043 = shalt.err (!%p2040_p0)
}
 0x9b2   : > { %s2044_s14 = scalar_lea.hbm %s2571_s1, 128  ;;  %s2048_s0 = scalar_lea.hbm %s2677_s12, 256 }
 0x9b3   : > { %p2045_p4 = scmp.ne.s32.totalorder %s2571_s1, %s2044_s14  ;;  %p2049_p7 = scmp.lt.u32.totalorder %s2571_s1, %s2677_s12 }
 0x9b4   : > { %p2050_p12 = scmp.lt.u32.totalorder %s2048_s0, %s2044_s14  ;;  %p2052_p2 = scmp.lt.u32.totalorder %s2044_s14, %s2571_s1 }
 0x9b5   : > { %p2046_p13 = pnand %p2045_p4, %p2678_p1 }
 0x9b6   : > { %p2051_p8 = por %p2050_p12, %p2049_p7 }
 0x9b7   : > { %p2047_p6 = pneg %p2046_p13 }
 0x9b8   : > { %p2053_p10 = por %p2052_p2, %p2051_p8 }
 0x9ba   : > { %p2054_p3 = pnand %p2053_p10, %p2047_p6 }
 0x9bc   : > { %2057 = shalt.err (!%p2054_p3)
}
 0x9bd   : > { %1826 = dma.vmem_to_hbm [thread:$0]  (%p2678_p1), %s2573_s16, 128, %s2571_s1, %s1508_s30  }
 0x9be PF: > { %s2679_s20 = sld [smem:[#allocation14_spill]]  ;;  %s2680_s10 = sld [smem:[#allocation15_spill]] }
 0x9bf   : > { %p2682_p9 = scmp.ge.s32.totalorder %s2116_s26, 2 }
 0x9c4   : > { %s1534_s15 = sand.u32 1, %s2679_s20   ;;  %p2681_p5 = scmp.ne.s32.totalorder %s2680_s10, 0 }
 0x9c5   : > { %s1535_s24 = scalar_lea.sflag [#allocation6], %s1534_s15 }
 0x9c6   : > { %p1840_p11 = pnand %p2682_p9, %p2681_p5 }
 0x9c8   : > { %2091 = dma.done.wait (!%p1840_p11), %s1535_s24, 128  }
 0x9c9   : > { %2093 = vsyncadd (!%p1840_p11), %s1535_s24, 4294967168  ;;  %s33_s26 = sadd.s32 1, %s2116_s26   ;;  %s2683_s21 = smov %s2100_s22 }
 0x9ca   : > { %p30_p0 = scmp.ge.s32.totalorder %s33_s26, 4   ;;  %s2684_s22 = smov %s2104_s23 }
 0x9cb   : > { %s2685_s23 = smov %s2360_s11  ;;  %s2686_s24 = smov %s2112_s25 }
 0x9cc   : > { %s2687_s25 = smov %s2689_s13  ;;  %32 = sbr.rel (!%p30_p0) target bundleno = 18 (0x12), region = 144 }
 0x9d3   :  { %1540 = vsyncpa [#allocation5], 1 }
 0x9d4   :  { %1542 = vsyncpa [#allocation5 + $0x1], 1 }
 0x9d5   :  { %1543 = vsyncpa [#allocation8], 1 }
 0x9d6   :  { %1544 = vsyncpa [#allocation6], 1 }
 0x9d7   :  { %1546 = vsyncpa [#allocation6 + $0x1], 1 }

// kernel: tpu_custom_call.1
= control target key start
LH: loop header
LB: loop body
LE: loop exit
PB: predicated region body
PF: predicated region fallthrough
CT: control target
= control target key end

     0   :  { %s2621_s0 = inlined_call_operand.vmem [shape: f32[2,8,32], index: 0, kind: input, shape index: {}]   ;;  %s2622_s1 = inlined_call_operand.hbm [shape: bf16[2,8,32], index: 1, kind: input, shape index: {}]   ;;  %s2623_s2 = inlined_call_operand.vmem [shape: bf16[32,32], index: 2, kind: input, shape index: {}]   ;;  %s2624_s3 = inlined_call_operand.vmem [shape: f32[1,32], index: 3, kind: input, shape index: {}]   ;;  %s2625_s4 = inlined_call_operand.vmem [shape: bf16[32,64], index: 4, kind: input, shape index: {}]   ;;  %s2626_s5 = inlined_call_operand.vmem [shape: f32[1,64], index: 5, kind: input, shape index: {}]   ;;  %s2627_s6 = inlined_call_operand.hbm [shape: bf16[32,32], index: 6, kind: input, shape index: {}]   ;;  %s2628_s7 = inlined_call_operand.vmem [shape: f32[1,32], index: 7, kind: input, shape index: {}]   ;;  %s2629_s8 = inlined_call_operand.hbm [shape: bf16[32,64], index: 8, kind: input, shape index: {}]   ;;  %s2630_s9 = inlined_call_operand.vmem [shape: f32[1,64], index: 9, kind: input, shape index: {}]   ;;  %s2631_s10 = inlined_call_operand.vmem [shape: bf16[64,32], index: 10, kind: input, shape index: {}]   ;;  %s2632_s11 = inlined_call_operand.vmem [shape: f32[1,32], index: 11, kind: input, shape index: {}]   ;;  %s2633_s12 = inlined_call_operand.vmem [shape: f32[1,32], index: 12, kind: input, shape index: {}]   ;;  %s2634_s13 = inlined_call_operand.vmem [shape: f32[1,32], index: 13, kind: input, shape index: {}]   ;;  %s2635_s14 = inlined_call_operand.vmem [shape: f32[1,32], index: 14, kind: input, shape index: {}]   ;;  %s2636_s15 = inlined_call_operand.vmem [shape: f32[1,32], index: 15, kind: input, shape index: {}]   ;;  %s2637_s16 = inlined_call_operand.hbm [shape: f32[2,8,32], index: 16, kind: output, shape index: {}]  }
   0x1   :  { %2646 = sst [smem:[#allocation16_spill]] %s2621_s0 }
   0x2   :  { %2647 = sst [smem:[#allocation17_spill]] %s2622_s1 }
   0x3   :  { %2648 = sst [smem:[#allocation18_spill]] %s2630_s9 }
   0x4   :  { %2649 = sst [smem:[#allocation19_spill]] %s2631_s10 }
   0x5   :  { %2650 = sst [smem:[#allocation20_spill]] %s2632_s11 }
   0x6   :  { %2651 = sst [smem:[#allocation21_spill]] %s2633_s12 }
   0x7   :  { %2652 = sst [smem:[#allocation22_spill]] %s2634_s13 }
   0x8   :  { %2653 = sst [smem:[#allocation23_spill]] %s2635_s14 }
   0x9   :  { %2654 = sst [smem:[#allocation24_spill]] %s2636_s15 }
   0xa   :  { %2655 = sst [smem:[#allocation25_spill]] %s2637_s16 }
   0xb   :  { %21 = vsyncpa [#allocation5], 0 }
   0xc   :  { %23 = vsyncpa [#allocation5 + $0x1], 0 }
   0xd   :  { %24 = vsyncpa [#allocation8], 0 }
   0xe   :  { %25 = vsyncpa [#allocation6], 0 }
   0xf   :  { %27 = vsyncpa [#allocation6 + $0x1], 0  ;;  %s2218_s21 = smov 0   ;;  %s2220_s22 = smov 0  }
  0x10   :  { %s2222_s23 = smov 0   ;;  %s2224_s24 = smov 0  }
  0x11   :  { %s2226_s25 = smov 0   ;;  %s2228_s26 = smov 0  }
  0x12 LB: > { %2656 = sst [smem:[#allocation14_spill]] %s2096_s21  ;;  %s1635_s27 = sadd.s32 4294967295, %s2116_s26   ;;  %s2116_s26 = sphi %s2228_s26, %s33_s26   ;;  %s2112_s25 = sphi %s2226_s25, %s2687_s25   ;;  %s2108_s24 = sphi %s2224_s24, %s2686_s24   ;;  %s2104_s23 = sphi %s2222_s23, %s2685_s23   ;;  %s2100_s22 = sphi %s2220_s22, %s2684_s22   ;;  %s2096_s21 = sphi %s2218_s21, %s2683_s21  }
  0x13   : > { %s1636_s28 = sadd.s32 4294967294, %s2116_s26   ;;  %p93_p0 = scmp.ne.s32.totalorder %s2100_s22, %s2096_s21 }
  0x14   : > { %p2252_p1 = scmp.eq.s32.totalorder %s1635_s27, 0  ;;  %p2256_p2 = scmp.eq.s32.totalorder %s1635_s27, 1 }
  0x15   : > { %p419_p3 = scmp.eq.s32.totalorder %s1636_s28, 1  ;;  %p1637_p5 = scmp.ge.s32.totalorder %s2116_s26, 1 }
  0x16   : > { %s2657_s29 = scalar_select %p2252_p1, 1, 0 }
  0x17   : > { %p2262_p4 = por %p2252_p1, %p93_p0  ;;  %p2267_p6 = por %p419_p3, %p93_p0 }
  0x18   : > { %p426_p7 = scmp.lt.s32.totalorder %s2116_s26, 3  ;;  %s2118_s19 = smov [#allocation7]  }
  0x19   : > { %s2659_s0 = scalar_select %p2262_p4, 1, 0 }
  0x1a   : > { %s2660_s17 = scalar_select %p2267_p6, 1, 0 }
  0x1b   : > { %p2272_p8 = pnand %p1637_p5, %p426_p7  ;;  %s450_s20 = sshll.u32 %s2118_s19, 4  ;;  %s2276_s20 = int_to_ptr.vmem [resolvable:$true] %s450_s20 }
  0x1c   : > { %2661 = sst [smem:[#allocation15_spill]] %s2660_s17  ;;  %s2119_s28 = smov [#allocation9]  }
  0x1d   : > { %p1828_p9 = pneg %p2272_p8  ;;  %s466_s17 = sshll.u32 %s2119_s28, 4  ;;  %s2287_s17 = int_to_ptr.vmem [resolvable:$true] %s466_s17 }
  0x1e   : > { %s1944_s19 = scalar_lea.hbm %s2627_s6, 256 }
  0x1f   : > { %p2283_p11 = pnand %p1828_p9, %p2252_p1  ;;  %p1945_p12 = scmp.ne.s32.totalorder %s2627_s6, %s1944_s19 }
  0x20   : > { %p1951_p5 = scmp.lt.u32.totalorder %s1944_s19, %s2627_s6 }
  0x21   : > { %p1946_p13 = pneg %p2283_p11 }
  0x23   : > { %p1947_p0 = pnand %p1946_p13, %p1945_p12 }
  0x25   : > { %p1948_p3 = pneg %p1947_p0 }
  0x27   : > { %p1953_p7 = pnand %p1951_p5, %p1948_p3 }
  0x29   : > { %1956 = shalt.err (!%p1953_p7)
}
  0x2a   : > { %s1957_s16 = scalar_lea.vmem %s2276_s20, 256  ;;  %p1965_p1 = scmp.lt.s32.totalorder %s2276_s20, %s2276_s20 }
  0x2b   : > { %p1958_p9 = scmp.ne.s32.totalorder %s2276_s20, %s1957_s16  ;;  %p1966_p12 = scmp.lt.s32.totalorder %s1957_s16, %s1957_s16 }
  0x2d   : > { %p1960_p10 = pnand %p1958_p9, %p1946_p13  ;;  %p1967_p0 = por %p1966_p12, %p1965_p1 }
  0x2f   : > { %p1961_p6 = pneg %p1960_p10 }
  0x31   : > { %p1968_p4 = pnand %p1967_p0, %p1961_p6 }
  0x33   : > { %1971 = shalt.err (!%p1968_p4)
}
  0x34   : > { %s2120_s9 = smov 64   ;;  %s2121_s11 = smov 4  }
  0x35   : > { %1831 = dma.hbm_to_vmem [thread:$0]  (!%p2283_p11), %s2627_s6, 256, %s2276_s20, [#allocation8], %s2120_s9, %s2120_s9, %s2121_s11  }
  0x36   : > { %s1972_s19 = scalar_lea.hbm %s2629_s8, 256 }
  0x37   : > { %p1973_p1 = scmp.ne.s32.totalorder %s2629_s8, %s1972_s19  ;;  %p1979_p10 = scmp.lt.u32.totalorder %s1972_s19, %s2629_s8 }
  0x39   : > { %p1975_p4 = pnand %p1973_p1, %p1946_p13 }
  0x3b   : > { %p1976_p6 = pneg %p1975_p4 }
  0x3d   : > { %p1981_p3 = pnand %p1979_p10, %p1976_p6 }
  0x3f   : > { %1984 = shalt.err (!%p1981_p3)
}
  0x40   : > { %s1985_s20 = scalar_lea.vmem %s2287_s17, 256  ;;  %p1993_p12 = scmp.lt.s32.totalorder %s2287_s17, %s2287_s17 }
  0x41   : > { %p1986_p5 = scmp.ne.s32.totalorder %s2287_s17, %s1985_s20  ;;  %p1994_p0 = scmp.lt.s32.totalorder %s1985_s20, %s1985_s20 }
  0x43   : > { %p1988_p7 = pnand %p1986_p5, %p1946_p13  ;;  %p1995_p1 = por %p1994_p0, %p1993_p12 }
  0x45   : > { %p1989_p9 = pneg %p1988_p7 }
  0x47   : > { %p1996_p4 = pnand %p1995_p1, %p1989_p9 }
  0x49   : > { %1999 = shalt.err (!%p1996_p4)
}
  0x4a   : > { %1834 = dma.hbm_to_vmem [thread:$0]  (!%p2283_p11), %s2629_s8, 256, %s2287_s17, [#allocation8], %s2120_s9, %s2120_s9, %s2121_s11  }
  0x4b   : > { %s45_s13 = sadd.s32 1, %s2112_s25  ;;  %s80_s14 = sadd.s32 1, %s2104_s23 }
  0x4c   : > { %p47_p13 = scmp.ge.s32.totalorder %s45_s13, 2  ;;  %p87_p6 = scmp.ne.s32.totalorder %s2104_s23, %s2100_s22 }
  0x4d   : > { %p88_p10 = scmp.eq.s32.totalorder %s2116_s26, 0  ;;  %p1845_p3 = scmp.lt.s32.totalorder %s2116_s26, 2 }
  0x4e   : > { %s2689_s13 = smov (%p47_p13, %s45_s13), 0  ;;  %p2351_p7 = por %p2256_p2, %p87_p6 }
  0x4f   : > { %p89_p5 = por %p88_p10, %p87_p6  ;;  %s77_s15 = ssub.s32 %s2112_s25, %s2689_s13 }
  0x50   : > { %s2664_s27 = scalar_select %p2351_p7, 1, 0 }
  0x51   : > { %s511_s21 = sand.u32 1, %s2104_s23   ;;  %p78_p9 = scmp.eq.s32.totalorder %s77_s15, 0 }
  0x52   : > { %s1641_s17 = sshll.u32 %s511_s21, 2  ;;  %s1642_s9 = sshll.u32 %s2112_s25, 6 }
  0x53   : > { %s2360_s11 = scalar_select %p78_p9, %s2104_s23, %s80_s14  }
  0x54   : > { %s2665_s1 = sld [smem:[#allocation17_spill]]  ;;  %s515_s30 = scalar_lea.vmem [#allocation4], %s1641_s17 }
  0x55   : > { %s522_s20 = sshll.u32 %s515_s30, 4  ;;  %p2369_p2 = pnand %p1845_p3, %p89_p5  ;;  %s2373_s20 = int_to_ptr.vmem [resolvable:$true] %s522_s20 }
  0x56   : > { %s512_s12 = scalar_lea.sflag [#allocation5], %s511_s21 }
  0x57   : > { %p2002_p12 = pneg %p2369_p2 }
  0x5a   : > { %s2365_s16 = scalar_lea.hbm %s2665_s1, %s1642_s9  ;;  %s2005_s9 = scalar_lea.hbm %s2665_s1, 128 }
  0x5b   : > { %s2000_s14 = scalar_lea.hbm %s2365_s16, 64  ;;  %p2006_p4 = scmp.lt.u32.totalorder %s2365_s16, %s2665_s1 }
  0x5c   : > { %p2001_p11 = scmp.ne.s32.totalorder %s2365_s16, %s2000_s14  ;;  %p2007_p13 = scmp.lt.u32.totalorder %s2005_s9, %s2000_s14 }
  0x5d   : > { %p2009_p10 = scmp.lt.u32.totalorder %s2000_s14, %s2365_s16 }
  0x5e   : > { %p2003_p0 = pnand %p2002_p12, %p2001_p11  ;;  %p2008_p6 = por %p2007_p13, %p2006_p4 }
  0x60   : > { %p2004_p1 = pneg %p2003_p0  ;;  %p2010_p3 = por %p2009_p10, %p2008_p6 }
  0x62   : > { %p2011_p5 = pnand %p2010_p3, %p2004_p1 }
  0x64   : > { %2014 = shalt.err (!%p2011_p5)
}
  0x65   : > { %s2015_s21 = scalar_lea.vmem %s2373_s20, 64  ;;  %s2122_s30 = smov [#allocation4]  }
  0x66   : > { %p2016_p9 = scmp.ne.s32.totalorder %s2373_s20, %s2015_s21  ;;  %s2020_s15 = sshll.u32 %s2122_s30, 4  ;;  %s2021_s15 = int_to_ptr.vmem [resolvable:$false] %s2020_s15 }
  0x67   : > { %s2022_s17 = scalar_lea.vmem %s2021_s15, 128  ;;  %p2023_p7 = scmp.lt.s32.totalorder %s2373_s20, %s2021_s15 }
  0x68   : > { %p2018_p11 = pnand %p2016_p9, %p2002_p12  ;;  %p2024_p4 = scmp.lt.s32.totalorder %s2022_s17, %s2015_s21 }
  0x6a   : > { %p2019_p0 = pneg %p2018_p11  ;;  %p2025_p13 = por %p2024_p4, %p2023_p7 }
  0x6c   : > { %p2026_p6 = pnand %p2025_p13, %p2019_p0 }
  0x6e   : > { %2029 = shalt.err (!%p2026_p6)
}
  0x6f   : > { %1838 = dma.hbm_to_vmem [thread:$0]  (!%p2369_p2), %s2365_s16, 64, %s2373_s20, %s512_s12  }
  0x70   : > { %531 = sbr.rel (%p2272_p8) target bundleno = 2494 (0x9be), region = 84  ;;  %s2403_s14 = sand.u32 (!%p2272_p8), 1, %s2100_s22  }
  0x71   : > { %s1644_s9 = sshll.u32 (!%p2272_p8), %s2403_s14, 2  ;;  %s534_s28 = scalar_lea.sflag (!%p2272_p8), [#allocation5], %s2403_s14 }
  0x72   : > { %s537_s19 = scalar_lea.vmem (!%p2272_p8), [#allocation4], %s1644_s9  ;;  %p2667_p7 = scmp.ne.s32.totalorder (!%p2272_p8), %s2659_s0, 0 }
  0x77   : > { %2083 = dma.done.wait (%p2667_p7), %s534_s28, 64  }
  0x78   : > { %2085 = vsyncadd (%p2667_p7), %s534_s28, 4294967232  ;;  %p2668_p12 = scmp.ne.s32.totalorder %s2657_s29, 0 }
  0x7a   : > { %2087 = dma.done.wait (%p2668_p12), [#allocation8], 512  }
  0x7b   : > { %2089 = vsyncadd (%p2668_p12), [#allocation8], 4294966784  ;;  %v2123_v0 = vmov 0.0   ;;  %vm2124_vm0 = vmmov 0   ;;  %p601_p8 = scmp.lt.s32.totalorder %s2108_s24, 1  ;;  %v1910_v1 = vld [vmem:[%s2625_s4] sm:$0xff]  }
  0x7c   : > { %1724 = vmatprep.subr.bf16.mxu1 %v2123_v0  ;;  %1728 = vmatprep.mubr.msk.bf16.mxu1 %vm2124_vm0, %v2123_v0  ;;  %v1911_v2 = vld [vmem:[%s2625_s4 + $0x8] sm:$0xff]   ;;  %vm637_vm1 = vcmask 261120   ;;  %v1912_v4 = vld [vmem:[%s2623_s2] sm:$0xff]   ;;  %s2669_s17 = sld [smem:[#allocation16_spill]]  ;;  %vm682_vm2 = vcmask 257024   ;;  %vm763_vm3 = vcmask 64512  }
  0x7d   : > { %1740 = vmatprep.subr.bf16.mxu0 %v2123_v0  ;;  %1742 = vmatprep.mubr.msk.bf16.mxu0 %vm2124_vm0, %v2123_v0  ;;  %s602_s29 = scalar_select %p601_p8, %s2108_s24, 1  ;;  %v613_v3 = vld [vmem:[%s537_s19] sm:$0xf]  ;;  %v1649_v8 = vld [vmem:[%s2626_s5] ss:$0 sm:$0xff]  ;;  %vm823_vm4 = vcmask 1043456  }
  0x7e   : > { %1725 = vmatpush3.bf16.msra.mxu1 %v1910_v1  ;;  %v1913_v5 = vld [vmem:[%s2623_s2 + $0x8] sm:$0xff]   ;;  %v1654_v15 = vld [vmem:[%s2624_s3] ss:$0 sm:$0xff]  ;;  %s2125_s20 = smov 112   ;;  %s2126_s10 = smov 120   ;;  %vm1222_vm5 = vcmask 130048  }
  0x7f   : > { %1726 = vmatprep.subr.bf16.mxu1 %v2123_v0  ;;  %s1648_s21 = sshll.u32 %s602_s29, 3  ;;  %s2127_s12 = smov 104   ;;  %vm1225_vm6 = vcmask 195584   ;;  %vm1432_vm7 = vcmask 523264  }
  0x80   : > { %s2129_s30 = smov 8   ;;  %s2130_s15 = smov 16  }
  0x81   : > { %s2670_s18 = sld [smem:[#allocation19_spill]]  ;;  %s2673_s16 = sld [smem:[#allocation18_spill]] }
  0x82   : > { %1727 = vmatpush3.bf16.msra.mxu1 %v1911_v2  ;;  %s607_s9 = scalar_lea.vmem %s2669_s17, %s1648_s21  ;;  %s2128_s21 = smov 96  }
  0x83   : > { %1732 = vmatprep.subr.bf16.mxu1 %v2123_v0  ;;  %v2443_v6 = vld [vmem:[%s607_s9] sm:$0xff]  ;;  %s2131_s17 = smov 24   ;;  %s2676_s0 = sld [smem:[#allocation24_spill]] }
  0x84   : > { %v692_v7 = vpack.c.bf16 %v2443_v6, %v2443_v6  ;;  %s1687_s19 = sshll.u32 %s2108_s24, 7  ;;  %p2678_p1 = scmp.ne.s32.totalorder %s2664_s27, 0 }
  0x85   : > { %1729 = vmatmul.mubr.msk.bf16.vlgmr.msra.gmra.mrb[0].mxu1 %vm637_vm1, %v613_v3  ;;  %s2132_s24 = smov [#allocation10]  }
  0x86   : > { %1733 = vmatpush3.bf16.msra.mxu1 %v1912_v4  ;;  %1736 = vmatprep.mubr.msk.bf16.mxu1 %vm2124_vm0, %v2123_v0 }
  0x87   : > { %1734 = vmatprep.subr.bf16.mxu1 %v2123_v0 }
  0x8a   : > { %1735 = vmatpush3.bf16.msra.mxu1 %v1913_v5 }
  0x8b   : > { %1746 = vmatprep.subr.bf16.mxu1 %v2123_v0 }
  0x8d   : > { %1737 = vmatmul.mubr.msk.bf16.vlgmr.msra.gmra.mrb[4].mxu1 %vm637_vm1, %v692_v7 }
  0x8e   : > { %1748 = vmatprep.mubr.msk.bf16.mxu1 %vm2124_vm0, %v2123_v0 }
 0x158   : > { %v675_v9 = vpop.f32.mrb[0].mxu1 }
 0x159   : > { %v676_v10 = vadd.f32 %v1649_v8, %v675_v9  ;;  %v1730_v11 = vpop.f32.mrb[1].mxu1 }
 0x15a   : > { %v678_v12 = vpop.f32.mrb[2].mxu1 }
 0x15b   : > { %v681_v13 = vpack.c.bf16 %v676_v10, %v676_v10  ;;  %v1731_v14 = vpop.f32.mrb[3].mxu1 }
 0x15d   : > { %683 = vst.msk [vmem:[#allocation2] sm:$0xf] %vm682_vm2, %v681_v13 }
 0x160   : > { %v754_v16 = vpop.f32.mrb[4].mxu1 }
 0x161   : > { %v1738_v17 = vpop.f32.mrb[5].mxu1  ;;  %v755_v19 = vadd.f32 %v1654_v15, %v754_v16 }
 0x162   : > { %v757_v18 = vpop.f32.mrb[6].mxu1 }
 0x163   : > { %v1739_v20 = vpop.f32.mrb[7].mxu1  ;;  %v760_v24 = vpack.c.bf16 %v755_v19, %v755_v19 }
 0x164   : > { %v761_v21 = vld [vmem:[#allocation2] sm:$0xf] }
 0x165   : > { %v768_v22 = vsel %vm763_vm3, %v761_v21, 0  ;;  %v1660_v23 = vcombine.low %v761_v21, %v761_v21 }
 0x166   : > { %1741 = vmatpush3.bf16.xpose.msra.mxu0 %v768_v22 }
 0x167   : > { %990 = vrot.lane.b32.xlu1 %v1660_v23, %s2125_s20  ;;  %876 = vrot.lane.b32.xlu0 %v1660_v23, %s2126_s10 }
 0x168   : > { %1752 = vmatprep.subr.bf16.mxu0 %v2123_v0 }
 0x16b   : > { %988 = vrot.lane.b32.xlu1 %v760_v24, %s2125_s20  ;;  %871 = vrot.lane.b32.xlu0 %v760_v24, %s2126_s10 }
 0x16d   : > { %1743 = vmatmul.mubr.msk.bf16.vlgmr.msra.gmra.mrb[0].mxu0 %vm763_vm3, %v760_v24 }
 0x16e   : > { %1754 = vmatprep.mubr.msk.bf16.mxu0 %vm2124_vm0, %v2123_v0 }
 0x16f   : > { %1099 = vrot.lane.b32.xlu1 %v760_v24, %s2127_s12  ;;  %1101 = vrot.lane.b32.xlu0 %v1660_v23, %s2127_s12 }
 0x173   : > { %687 = vrot.lane.b32.xlu0 %v681_v13, %s2128_s21  ;;  %s1647_s21 = sshll.u32 %s2403_s14, 3 }
 0x174   : > { %s600_s29 = scalar_lea.vmem [#allocation10], %s1647_s21  ;;  %s2034_s21 = sshll.u32 %s2132_s24, 4  ;;  %s2035_s21 = int_to_ptr.vmem [resolvable:$false] %s2034_s21 }
 0x1d9   : > { %v877_v25 = vpop.permute.xlu0 %876  ;;  %v991_v28 = vpop.permute.xlu1 %990 }
 0x1da   : > { %v882_v26 = vsel %vm763_vm3, %v877_v25, 0  ;;  %v996_v30 = vsel %vm763_vm3, %v991_v28, 0 }
 0x1db   : > { %1753 = vmatpush3.bf16.xpose.msra.mxu0 %v882_v26 }
 0x1dc   : > { %1764 = vmatprep.subr.bf16.mxu0 %v2123_v0 }
 0x1dd   : > { %v872_v27 = vpop.permute.xlu0 %871  ;;  %v989_v32 = vpop.permute.xlu1 %988 }
 0x1e1   : > { %v1102_v29 = vpop.permute.xlu0 %1101  ;;  %v1100_v36 = vpop.permute.xlu1 %1099 }
 0x1e2   : > { %1755 = vmatmul.mubr.msk.bf16.vlgmr.msra.gmra.mrb[4].mxu0 %vm763_vm3, %v872_v27  ;;  %v1107_v33 = vsel %vm763_vm3, %v1102_v29, 0 }
 0x1e3   : > { %1765 = vmatpush3.bf16.xpose.msra.mxu0 %v996_v30  ;;  %1766 = vmatprep.mubr.msk.bf16.mxu0 %vm2124_vm0, %v2123_v0 }
 0x1e4   : > { %1776 = vmatprep.subr.bf16.mxu0 %v2123_v0 }
 0x1e5   : > { %v688_v31 = vpop.permute.xlu0 %687 }
 0x1e6   : > { %690 = vst.msk [vmem:[#allocation3] sm:$0xf] %vm682_vm2, %v688_v31 }
 0x1ea   : > { %1767 = vmatmul.mubr.msk.bf16.vlgmr.msra.gmra.mrb[8].mxu0 %vm763_vm3, %v989_v32 }
 0x1eb   : > { %1777 = vmatpush3.bf16.xpose.msra.mxu0 %v1107_v33  ;;  %1778 = vmatprep.mubr.msk.bf16.mxu0 %vm2124_vm0, %v2123_v0 }
 0x1ec   : > { %1788 = vmatprep.subr.bf16.mxu0 %v2123_v0 }
 0x1ed   : > { %v762_v34 = vld [vmem:[#allocation3] sm:$0xf] }
 0x1ee   : > { %v825_v35 = vsel %vm823_vm4, %v762_v34, 0  ;;  %v1662_v42 = vcombine.low %v762_v34, %v762_v34  ;;  %v1916_v34 = vld [vmem:[#allocation7] sm:$0xff]  }
 0x1ef   : > { %1747 = vmatpush3.bf16.msra.mxu1 %v825_v35 }
 0x1f0   : > { %1758 = vmatprep.subr.bf16.mxu1 %v2123_v0 }
 0x1f2   : > { %1779 = vmatmul.mubr.msk.bf16.vlgmr.msra.gmra.mrb[12].mxu0 %vm763_vm3, %v1100_v36 }
 0x1f3   : > { %1792 = vmatprep.mubr.msk.bf16.mxu0 %vm2124_vm0, %v2123_v0  ;;  %1789 = vmatpush3.bf16.msra.mxu0 %v1916_v34 }
 0x1f4   : > { %1790 = vmatprep.subr.bf16.mxu0 %v2123_v0 }
 0x240   : > { %v804_v37 = vpop.f32.mrb[0].mxu0 }
 0x241   : > { %v1744_v38 = vpop.f32.mrb[1].mxu0  ;;  %v810_v39 = vsel %vm763_vm3, %v804_v37, -inf }
 0x242   : > { %811 = vmax.xlane.f32.xlu1 %v810_v39  ;;  %v807_v40 = vpop.f32.mrb[2].mxu0  ;;  %v1917_v38 = vld [vmem:[#allocation7 + $0x8] sm:$0xff]  }
 0x243   : > { %v1745_v41 = vpop.f32.mrb[3].mxu0  ;;  %1791 = vmatpush3.bf16.msra.mxu0 %v1917_v38 }
 0x244   : > { %1804 = vmatprep.subr.bf16.mxu0 %v2123_v0 }
 0x253   : > { %1048 = vrot.lane.b32.xlu1 %v1662_v42, %s2125_s20 }
 0x2b5   : > { %v918_v43 = vpop.f32.mrb[4].mxu0 }
 0x2b6   : > { %v1756_v44 = vpop.f32.mrb[5].mxu0  ;;  %v924_v45 = vsel %vm763_vm3, %v918_v43, -inf }
 0x2b7   : > { %925 = vmax.xlane.f32.xlu0 %v924_v45  ;;  %v921_v46 = vpop.f32.mrb[6].mxu0 }
 0x2b8   : > { %v1757_v47 = vpop.f32.mrb[7].mxu0 }
 0x2bd   : > { %v1032_v48 = vpop.f32.mrb[8].mxu0 }
 0x2be   : > { %v1768_v49 = vpop.f32.mrb[9].mxu0  ;;  %v1038_v50 = vsel %vm763_vm3, %v1032_v48, -inf }
 0x2bf   : > { %1039 = vmax.xlane.f32.xlu0 %v1038_v50  ;;  %v1035_v51 = vpop.f32.mrb[10].mxu0 }
 0x2c0   : > { %v1769_v52 = vpop.f32.mrb[11].mxu0 }
 0x2c5   : > { %v1143_v53 = vpop.f32.mrb[12].mxu0 }
 0x2c6   : > { %v1780_v54 = vpop.f32.mrb[13].mxu0  ;;  %v1149_v55 = vsel %vm763_vm3, %v1143_v53, -inf }
 0x2c7   : > { %1150 = vmax.xlane.f32.xlu1 %v1149_v55  ;;  %v1146_v56 = vpop.f32.mrb[14].mxu0 }
 0x2c8   : > { %v1781_v57 = vpop.f32.mrb[15].mxu0 }
 0x2cf   : > { %v812_v58 = vpop.xlane.xlu1 %811 }
 0x2d0   : > { %v813_v59 = vsub.f32 %v804_v37, %v812_v58 }
 0x2d2   : > { %v814_v60 = vmul.f32 1.442695, %v813_v59 }
 0x2d3   : > { %v1049_v7 = vpop.permute.xlu1 %1048 }
 0x2d4   : > { %1924 = vpow2.f32 %v814_v60  ;;  %v1054_v15 = vsel %vm823_vm4, %v1049_v7, 0 }
 0x2d5   : > { %937 = vrot.lane.b32.xlu0 %v1662_v42, %s2126_s10 }
 0x2d8   : > { %1159 = vrot.lane.b32.xlu1 %v1662_v42, %s2127_s12  ;;  %s2671_s12 = sld [smem:[#allocation21_spill]] }
 0x2de   : > { %v1925_v61 = vpop.eup %1924 }
 0x2df   : > { %v819_v62 = vpack.c.bf16 %v1925_v61, %v1925_v61  ;;  %v816_v25 = vsel %vm763_vm3, %v1925_v61, 0.0 }
 0x2e1   : > { %1749 = vmatmul.mubr.msk.bf16.vlgmr.msra.gmra.mrb[8].mxu1 %vm763_vm3, %v819_v62 }
 0x2e2   : > { %1760 = vmatprep.mubr.msk.bf16.mxu1 %vm2124_vm0, %v2123_v0 }
 0x344   : > { %v926_v63 = vpop.xlane.xlu0 %925 }
 0x345   : > { %v927_v1 = vsub.f32 %v918_v43, %v926_v63 }
 0x347   : > { %v928_v2 = vmul.f32 1.442695, %v927_v1 }
 0x349   : > { %1926 = vpow2.f32 %v928_v2 }
 0x34c   : > { %v1040_v3 = vpop.xlane.xlu0 %1039 }
 0x34d   : > { %v1041_v4 = vsub.f32 %v1032_v48, %v1040_v3  ;;  %v1668_v3 = vld [vmem:[%s2628_s7] ss:$0 sm:$0xff] }
 0x34f   : > { %v1042_v5 = vmul.f32 1.442695, %v1041_v4 }
 0x350   : > { %v938_v8 = vpop.permute.xlu0 %937 }
 0x351   : > { %1928 = vpow2.f32 %v1042_v5  ;;  %v943_v9 = vsel %vm823_vm4, %v938_v8, 0 }
 0x352   : > { %1759 = vmatpush3.bf16.msra.mxu1 %v943_v9 }
 0x353   : > { %v1927_v10 = vpop.eup %1926  ;;  %1770 = vmatprep.subr.bf16.mxu1 %v2123_v0 }
 0x354   : > { %v1151_v11 = vpop.xlane.xlu1 %1150  ;;  %v930_v12 = vsel %vm763_vm3, %v1927_v10, 0.0  ;;  %v933_v13 = vpack.c.bf16 %v1927_v10, %v1927_v10 }
 0x355   : > { %v1152_v14 = vsub.f32 %v1143_v53, %v1151_v11  ;;  %931 = vadd.xlane.f32.xlu0 %v930_v12 }
 0x356   : > { %1761 = vmatmul.mubr.msk.bf16.vlgmr.msra.gmra.mrb[12].mxu1 %vm763_vm3, %v933_v13 }
 0x357   : > { %v1153_v16 = vmul.f32 1.442695, %v1152_v14  ;;  %1771 = vmatpush3.bf16.msra.mxu1 %v1054_v15  ;;  %1772 = vmatprep.mubr.msk.bf16.mxu1 %vm2124_vm0, %v2123_v0 }
 0x358   : > { %1782 = vmatprep.subr.bf16.mxu1 %v2123_v0  ;;  %v1160_v18 = vpop.permute.xlu1 %1159 }
 0x359   : > { %1930 = vpow2.f32 %v1153_v16  ;;  %v1165_v21 = vsel %vm823_vm4, %v1160_v18, 0  ;;  %v1919_v18 = vld [vmem:[#allocation9 + $0x8] sm:$0xff]  }
 0x35b   : > { %v1929_v17 = vpop.eup %1928 }
 0x35c   : > { %v1044_v19 = vsel %vm763_vm3, %v1929_v17, 0.0  ;;  %v1047_v20 = vpack.c.bf16 %v1929_v17, %v1929_v17  ;;  %v1918_v17 = vld [vmem:[#allocation9] sm:$0xff]  }
 0x35d   : > { %1045 = vadd.xlane.f32.xlu1 %v1044_v19  ;;  %v1921_v19 = vld [vmem:[%s2670_s18 + $0x8] sm:$0xff]  }
 0x35e   : > { %1773 = vmatmul.mubr.msk.bf16.vlgmr.msra.gmra.mrb[16].mxu1 %vm763_vm3, %v1047_v20 }
 0x35f   : > { %1783 = vmatpush3.bf16.msra.mxu1 %v1165_v21  ;;  %1784 = vmatprep.mubr.msk.bf16.mxu1 %vm2124_vm0, %v2123_v0 }
 0x360   : > { %1796 = vmatprep.subr.bf16.mxu1 %v2123_v0 }
 0x363   : > { %v1931_v22 = vpop.eup %1930 }
 0x364   : > { %v1155_v23 = vsel %vm763_vm3, %v1931_v22, 0.0  ;;  %v1158_v24 = vpack.c.bf16 %v1931_v22, %v1931_v22 }
 0x365   : > { %1156 = vadd.xlane.f32.xlu0 %v1155_v23 }
 0x366   : > { %1785 = vmatmul.mubr.msk.bf16.vlgmr.msra.gmra.mrb[20].mxu1 %vm763_vm3, %v1158_v24  ;;  %v1672_v24 = vld [vmem:[%s2671_s12] ss:$0 sm:$0xff]  ;;  %s2674_s12 = sld [smem:[#allocation20_spill]] }
 0x367   : > { %1800 = vmatprep.mubr.msk.bf16.mxu1 %vm2124_vm0, %v2123_v0  ;;  %1797 = vmatpush3.bf16.msra.mxu1 %v1918_v17 }
 0x368   : > { %1798 = vmatprep.subr.bf16.mxu1 %v2123_v0 }
 0x369   : > { %817 = vadd.xlane.f32.xlu0 %v816_v25 }
 0x36b   : > { %1799 = vmatpush3.bf16.msra.mxu1 %v1919_v18 }
 0x3b4   : > { %v861_v26 = vpop.f32.mrb[8].mxu1 }
 0x3b5   : > { %v1750_v27 = vpop.f32.mrb[9].mxu1 }
 0x3b6   : > { %v864_v28 = vpop.f32.mrb[10].mxu1 }
 0x3b7   : > { %v1751_v29 = vpop.f32.mrb[11].mxu1 }
 0x3e2   : > { %v932_v30 = vpop.xlane.xlu0 %931 }
 0x3e3   : > { %1932 = vrcp.f32 %v932_v30  ;;  %v1922_v30 = vld [vmem:[%s2670_s18 + $0x10] sm:$0xff]  }
 0x3ea   : > { %v1046_v31 = vpop.xlane.xlu1 %1045 }
 0x3eb   : > { %1934 = vrcp.f32 %v1046_v31  ;;  %v1923_v31 = vld [vmem:[%s2670_s18 + $0x18] sm:$0xff]  }
 0x3ed   : > { %v1933_v32 = vpop.eup %1932 }
 0x3f2   : > { %v1157_v39 = vpop.xlane.xlu0 %1156 }
 0x3f3   : > { %1936 = vrcp.f32 %v1157_v39 }
 0x3f5   : > { %v1935_v42 = vpop.eup %1934 }
 0x3f6   : > { %v818_v56 = vpop.xlane.xlu0 %817 }
 0x3f7   : > { %1938 = vrcp.f32 %v818_v56 }
 0x3fd   : > { %v1937_v49 = vpop.eup %1936 }
 0x401   : > { %v1939_v57 = vpop.eup %1938 }
 0x402   : > { %v868_v58 = vmul.f32 %v1939_v57, %v861_v26 }
 0x404   : > { %v869_v60 = vpack.c.bf16 %v868_v58, %v868_v58  ;;  %v1685_v58 = vld [vmem:[%s2676_s0] ss:$0 sm:$0xff] }
 0x429   : > { %v979_v33 = vpop.f32.mrb[12].mxu1 }
 0x42a   : > { %v986_v35 = vmul.f32 %v1933_v32, %v979_v33  ;;  %v1762_v36 = vpop.f32.mrb[13].mxu1  ;;  %v1674_v32 = vld [vmem:[%s2673_s16] ss:$0 sm:$0xff]  ;;  %s1522_s16 = sshll.u32 %s600_s29, 4  ;;  %s2573_s16 = int_to_ptr.vmem [resolvable:$true] %s1522_s16 }
 0x42b   : > { %v982_v37 = vpop.f32.mrb[14].mxu1  ;;  %p2037_p5 = scmp.lt.s32.totalorder %s2573_s16, %s2035_s21 }
 0x42c   : > { %v987_v40 = vpack.c.bf16 %v986_v35, %v986_v35  ;;  %v1763_v41 = vpop.f32.mrb[15].mxu1 }
 0x42e   : > { %1211 = vrot.lane.b32.xlu1 %v987_v40, %s2129_s30  ;;  %s1508_s30 = scalar_lea.sflag [#allocation6], %s2403_s14 }
 0x431   : > { %v1090_v43 = vpop.f32.mrb[16].mxu1 }
 0x432   : > { %v1097_v44 = vmul.f32 %v1935_v42, %v1090_v43  ;;  %v1774_v45 = vpop.f32.mrb[17].mxu1 }
 0x433   : > { %v1093_v46 = vpop.f32.mrb[18].mxu1 }
 0x434   : > { %v1098_v47 = vpack.c.bf16 %v1097_v44, %v1097_v44  ;;  %v1775_v48 = vpop.f32.mrb[19].mxu1 }
 0x436   : > { %1214 = vrot.lane.b32.xlu0 %v1098_v47, %s2130_s15  ;;  %s2672_s15 = sld [smem:[#allocation22_spill]] }
 0x439   : > { %v1201_v50 = vpop.f32.mrb[20].mxu1 }
 0x43a   : > { %v1208_v51 = vmul.f32 %v1937_v49, %v1201_v50  ;;  %v1786_v52 = vpop.f32.mrb[21].mxu1 }
 0x43b   : > { %v1204_v53 = vpop.f32.mrb[22].mxu1 }
 0x43c   : > { %v1209_v54 = vpack.c.bf16 %v1208_v51, %v1208_v51  ;;  %v1787_v55 = vpop.f32.mrb[23].mxu1  ;;  %v1673_v26 = vld [vmem:[%s2672_s15] ss:$0 sm:$0xff]  ;;  %s2030_s15 = scalar_lea.vmem %s2573_s16, 128 }
 0x43d   : > { %p2031_p2 = scmp.ne.s32.totalorder %s2573_s16, %s2030_s15 }
 0x43e   : > { %1217 = vrot.lane.b32.xlu1 %v1209_v54, %s2131_s17  ;;  %s2675_s17 = sld [smem:[#allocation23_spill]] }
 0x43f   : > { %p2032_p10 = pnand %p2031_p2, %p2678_p1 }
 0x441   : > { %p2033_p3 = pneg %p2032_p10 }
 0x444   : > { %v1684_v56 = vld [vmem:[%s2675_s17] ss:$0 sm:$0xff]  ;;  %s2036_s17 = scalar_lea.vmem %s2035_s21, 256 }
 0x445   : > { %p2038_p9 = scmp.lt.s32.totalorder %s2036_s17, %s2030_s15 }
 0x447   : > { %p2039_p11 = por %p2038_p9, %p2037_p5 }
 0x449   : > { %p2040_p0 = pnand %p2039_p11, %p2033_p3 }
 0x4a0   : > { %v1212_v59 = vpop.permute.xlu1 %1211 }
 0x4a1   : > { %v1221_v62 = vsel %vm763_vm3, %v869_v60, %v1212_v59 }
 0x4a8   : > { %v1215_v61 = vpop.permute.xlu0 %1214 }
 0x4a9   : > { %v1224_v63 = vsel %vm1222_vm5, %v1221_v62, %v1215_v61 }
 0x4b0   : > { %v1218_v1 = vpop.permute.xlu1 %1217 }
 0x4b1   : > { %v1227_v2 = vsel %vm1225_vm6, %v1224_v63, %v1218_v1 }
 0x4b2   : > { %1793 = vmatmul.mubr.msk.bf16.vlgmr.msra.gmra.mrb[16].mxu0 %vm637_vm1, %v1227_v2 }
 0x4b3   : > { %1812 = vmatprep.mubr.msk.bf16.mxu0 %vm2124_vm0, %v2123_v0 }
 0x585   : > { %v1287_v4 = vpop.f32.mrb[16].mxu0 }
 0x586   : > { %v1288_v5 = vadd.f32 %v1668_v3, %v1287_v4  ;;  %v1794_v7 = vpop.f32.mrb[17].mxu0 }
 0x587   : > { %v1290_v8 = vpop.f32.mrb[18].mxu0 }
 0x588   : > { %v1795_v9 = vpop.f32.mrb[19].mxu0  ;;  %v1293_v10 = vadd.f32 %v1288_v5, %v2443_v6  ;;  %v1920_v6 = vld [vmem:[%s2670_s18] sm:$0xff]  }
 0x589   : > { %1805 = vmatpush3.bf16.msra.mxu0 %v1920_v6 }
 0x58a   : > { %v1296_v11 = vsel %vm637_vm1, %v1293_v10, 0.0  ;;  %1806 = vmatprep.subr.bf16.mxu0 %v2123_v0 }
 0x58b   : > { %1297 = vadd.xlane.f32.xlu1 %v1296_v11 }
 0x58d   : > { %1807 = vmatpush3.bf16.msra.mxu0 %v1921_v19 }
 0x58e   : > { %1808 = vmatprep.subr.bf16.mxu0 %v2123_v0 }
 0x591   : > { %1809 = vmatpush3.bf16.msra.mxu0 %v1922_v30 }
 0x592   : > { %1810 = vmatprep.subr.bf16.mxu0 %v2123_v0  ;;  %v1678_v0 = vld [vmem:[%s2674_s12] ss:$0 sm:$0xff]  ;;  %s2677_s12 = sld [smem:[#allocation25_spill]] }
 0x595   : > { %1811 = vmatpush3.bf16.msra.mxu0 %v1923_v31 }
 0x598   : > { %s2571_s1 = scalar_lea.hbm %s2677_s12, %s1687_s19 }
 0x618   : > { %v1298_v12 = vpop.xlane.xlu1 %1297 }
 0x619   : > { %v1300_v13 = vmul.f32 0.03125, %v1298_v12 }
 0x61b   : > { %v1301_v14 = vsub.f32 %v1293_v10, %v1300_v13 }
 0x61d   : > { %v1302_v15 = vmul.f32 %v1301_v14, %v1301_v14 }
 0x61f   : > { %v1303_v16 = vsel %vm637_vm1, %v1302_v15, 0.0 }
 0x620   : > { %1304 = vadd.xlane.f32.xlu0 %v1303_v16 }
 0x6ad   : > { %v1305_v20 = vpop.xlane.xlu0 %1304 }
 0x6ae   : > { %v1306_v21 = vmul.f32 0.03125, %v1305_v20 }
 0x6b0   : > { %v1307_v22 = vadd.f32 1e-05, %v1306_v21 }
 0x6b2   : > { %1940 = vrsqrt.f32 %v1307_v22 }
 0x6bc   : > { %v1941_v23 = vpop.eup %1940 }
 0x6bd   : > { %v1309_v25 = vmul.f32 %v1941_v23, %v1301_v14 }
 0x6bf   : > { %v1316_v27 = vmul.f32 %v1672_v24, %v1309_v25 }
 0x6c1   : > { %v1323_v28 = vadd.f32 %v1673_v26, %v1316_v27 }
 0x6c3   : > { %v1324_v29 = vpack.c.bf16 %v1323_v28, %v1323_v28 }
 0x6c5   : > { %1801 = vmatmul.mubr.msk.bf16.vlgmr.msra.gmra.mrb[24].mxu1 %vm637_vm1, %v1324_v29 }
 0x798   : > { %v1385_v33 = vpop.f32.mrb[24].mxu1 }
 0x799   : > { %v1386_v34 = vadd.f32 %v1674_v32, %v1385_v33  ;;  %v1802_v35 = vpop.f32.mrb[25].mxu1 }
 0x79a   : > { %v1388_v36 = vpop.f32.mrb[26].mxu1 }
 0x79b   : > { %v1391_v37 = vmax.f32 %v1386_v34, 0.0  ;;  %v1803_v38 = vpop.f32.mrb[27].mxu1 }
 0x79d   : > { %v1392_v39 = vpack.c.bf16 %v1391_v37, %v1391_v37 }
 0x79f   : > { %1813 = vmatmul.mubr.msk.bf16.vlgmr.msra.gmra.mrb[20].mxu0 %vm1432_vm7, %v1392_v39 }
 0x872   : > { %v1470_v40 = vpop.f32.mrb[20].mxu0 }
 0x873   : > { %v1471_v41 = vadd.f32 %v1678_v0, %v1470_v40  ;;  %v1814_v42 = vpop.f32.mrb[21].mxu0 }
 0x874   : > { %v1473_v43 = vpop.f32.mrb[22].mxu0 }
 0x875   : > { %v1815_v44 = vpop.f32.mrb[23].mxu0  ;;  %v1476_v45 = vadd.f32 %v1471_v41, %v1323_v28 }
 0x877   : > { %v1479_v46 = vsel %vm637_vm1, %v1476_v45, 0.0 }
 0x878   : > { %1480 = vadd.xlane.f32.xlu0 %v1479_v46 }
 0x905   : > { %v1481_v47 = vpop.xlane.xlu0 %1480 }
 0x906   : > { %v1482_v48 = vmul.f32 0.03125, %v1481_v47 }
 0x908   : > { %v1483_v49 = vsub.f32 %v1476_v45, %v1482_v48 }
 0x90a   : > { %v1484_v50 = vmul.f32 %v1483_v49, %v1483_v49 }
 0x90c   : > { %v1485_v51 = vsel %vm637_vm1, %v1484_v50, 0.0 }
 0x90d   : > { %1486 = vadd.xlane.f32.xlu1 %v1485_v51 }
 0x99a   : > { %v1487_v52 = vpop.xlane.xlu1 %1486 }
 0x99b   : > { %v1488_v53 = vmul.f32 0.03125, %v1487_v52 }
 0x99d   : > { %v1489_v54 = vadd.f32 1e-05, %v1488_v53 }
 0x99f   : > { %1942 = vrsqrt.f32 %v1489_v54 }
 0x9a9   : > { %v1943_v55 = vpop.eup %1942 }
 0x9aa   : > { %v1491_v57 = vmul.f32 %v1943_v55, %v1483_v49 }
 0x9ac   : > { %v1498_v59 = vmul.f32 %v1684_v56, %v1491_v57 }
 0x9ae   : > { %v1505_v60 = vadd.f32 %v1685_v58, %v1498_v59 }
 0x9b0   : > { %1506 = vst.msk [vmem:[%s600_s29] sm:$0xff] %vm637_vm1, %v1505_v60 }
 0x9b1   : > { %2043 = shalt.err (!%p2040_p0)
}
 0x9b2   : > { %s2044_s14 = scalar_lea.hbm %s2571_s1, 128  ;;  %s2048_s0 = scalar_lea.hbm %s2677_s12, 256 }
 0x9b3   : > { %p2045_p4 = scmp.ne.s32.totalorder %s2571_s1, %s2044_s14  ;;  %p2049_p7 = scmp.lt.u32.totalorder %s2571_s1, %s2677_s12 }
 0x9b4   : > { %p2050_p12 = scmp.lt.u32.totalorder %s2048_s0, %s2044_s14  ;;  %p2052_p2 = scmp.lt.u32.totalorder %s2044_s14, %s2571_s1 }
 0x9b5   : > { %p2046_p13 = pnand %p2045_p4, %p2678_p1 }
 0x9b6   : > { %p2051_p8 = por %p2050_p12, %p2049_p7 }
 0x9b7   : > { %p2047_p6 = pneg %p2046_p13 }
 0x9b8   : > { %p2053_p10 = por %p2052_p2, %p2051_p8 }
 0x9ba   : > { %p2054_p3 = pnand %p2053_p10, %p2047_p6 }
 0x9bc   : > { %2057 = shalt.err (!%p2054_p3)
}
 0x9bd   : > { %1826 = dma.vmem_to_hbm [thread:$0]  (%p2678_p1), %s2573_s16, 128, %s2571_s1, %s1508_s30  }
 0x9be PF: > { %s2679_s20 = sld [smem:[#allocation14_spill]]  ;;  %s2680_s10 = sld [smem:[#allocation15_spill]] }
 0x9bf   : > { %p2682_p9 = scmp.ge.s32.totalorder %s2116_s26, 2 }
 0x9c4   : > { %s1534_s15 = sand.u32 1, %s2679_s20   ;;  %p2681_p5 = scmp.ne.s32.totalorder %s2680_s10, 0 }
 0x9c5   : > { %s1535_s24 = scalar_lea.sflag [#allocation6], %s1534_s15 }
 0x9c6   : > { %p1840_p11 = pnand %p2682_p9, %p2681_p5 }
 0x9c8   : > { %2091 = dma.done.wait (!%p1840_p11), %s1535_s24, 128  }
 0x9c9   : > { %2093 = vsyncadd (!%p1840_p11), %s1535_s24, 4294967168  ;;  %s33_s26 = sadd.s32 1, %s2116_s26   ;;  %s2683_s21 = smov %s2100_s22 }
 0x9ca   : > { %p30_p0 = scmp.ge.s32.totalorder %s33_s26, 4   ;;  %s2684_s22 = smov %s2104_s23 }
 0x9cb   : > { %s2685_s23 = smov %s2360_s11  ;;  %s2686_s24 = smov %s2112_s25 }
 0x9cc   : > { %s2687_s25 = smov %s2689_s13  ;;  %32 = sbr.rel (!%p30_p0) target bundleno = 18 (0x12), region = 144 }
 0x9d3   :  { %1540 = vsyncpa [#allocation5], 1 }
 0x9d4   :  { %1542 = vsyncpa [#allocation5 + $0x1], 1 }
 0x9d5   :  { %1543 = vsyncpa [#allocation8], 1 }
 0x9d6   :  { %1544 = vsyncpa [#allocation6], 1 }
 0x9d7   :  { %1546 = vsyncpa [#allocation6 + $0x1], 1 }

</bundles_post_ra>
